<compile_context>
chip_gen: v5e
topology: v5e:2x2
jax: 0.10.0
libtpu: 0.0.40
codegen_flags: <defaults>
</compile_context>

<pallas_src>
import functools

import jax
import jax.numpy as jnp
import numpy as np
from jax.experimental import pallas as pl
from jax.experimental.pallas import tpu as pltpu


# -----------------------------------------------------------------------------
# Kernel 1: folded sub-pixel 3x3 conv (+ bias) on the original-resolution input.
# -----------------------------------------------------------------------------
def _subpixel_conv_kernel(x_ref, w_ref, b_ref, y_ref, s_ref, q_ref, *, H, W):
    """x_ref:  (1, H+2, W+2, Cin_p)  zero-padded original-resolution NHWC image
       w_ref:  (4, 4, Cout, Cin_p)   folded 2x2 weights per (phase py*2+px, tap
                                     dy*2+dx), pre-transposed for A @ B^T
       b_ref:  (Cout, 1)             conv bias (column vector)
       y_ref:  (1, 2, 2, Cout, H*W)  conv+bias output, phase-separated,
                                     channel-major (lane dim = H*W -> dense)
       s_ref/q_ref: (1, Cout, 1)     per-image sum / sum-of-squares of the
                                     PRE-bias conv output (shifted statistics)
    """
    x = x_ref[0]                       # (H+2, W+2, Cin_p)
    bias = b_ref[...]                  # (Cout, 1)
    HW = H * W
    cin = x.shape[-1]
    cout = bias.shape[0]

    s_acc = jnp.zeros((cout, 1), jnp.float32)
    q_acc = jnp.zeros((cout, 1), jnp.float32)

    for py in range(2):
        for px in range(2):
            p = py * 2 + px
            acc = jnp.zeros((cout, HW), jnp.float32)
            # 2x2 folded taps on the ORIGINAL input (vs 3x3 taps on a 4x larger
            # upsampled image): ~2.25x fewer MACs and no upsample in HBM/VMEM.
            for dy in range(2):
                for dx in range(2):
                    patch = x[py + dy:py + dy + H, px + dx:px + dx + W, :]
                    patch = patch.reshape(HW, cin)
                    # (Cout, Cin_p) x (HW, Cin_p)^T -> (Cout, HW): channel-major
                    # result straight off the MXU (q @ k.T pattern), no extra
                    # transpose matmul needed.
                    acc = acc + jax.lax.dot_general(
                        w_ref[p, dy * 2 + dx], patch,
                        (((1,), (1,)), ((), ())),
                        preferred_element_type=jnp.float32)
            # Shifted (pre-bias) partial batch statistics for this image.
            s_acc = s_acc + acc.sum(axis=1, keepdims=True)
            q_acc = q_acc + (acc * acc).sum(axis=1, keepdims=True)
            # Add bias and store this phase (lane-dense: minor dim = H*W).
            y_ref[0, py, px] = acc + bias

    s_ref[...] = s_acc.reshape(1, cout, 1)
    q_ref[...] = q_acc.reshape(1, cout, 1)


# -----------------------------------------------------------------------------
# Kernel 2: fused BatchNorm affine (folded scale/shift) + ReLU, lane-dense,
#           channel-major, writing the final NCHW layout in place.
# -----------------------------------------------------------------------------
def _bn_relu_kernel(y_ref, scale_ref, shift_ref, o_ref):
    o_ref[...] = jnp.maximum(y_ref[...] * scale_ref[...] + shift_ref[...], 0.0)


# -----------------------------------------------------------------------------
# Wrapper-side helpers (tiny, trace-time / XLA glue).
# -----------------------------------------------------------------------------
def _fold_subpixel_weights(w_oihw):
    """Fold the 3x3 kernel into 4 per-phase 2x2 kernels (nearest-2x sub-pixel
    identity).  Returns (4 phases [py*2+px], 4 taps [dy*2+dx], Cout, Cin)."""
    w = w_oihw.astype(jnp.float32)                       # (Cout, Cin, 3, 3)
    cout, cin = w.shape[0], w.shape[1]
    # Original 3x3 tap indices contributing to folded tap d of phase p (per axis).
    fold = {(0, 0): (0,), (0, 1): (1, 2), (1, 0): (0, 1), (1, 1): (2,)}
    phases = []
    for py in range(2):
        for px in range(2):
            taps = []
            for dy in range(2):
                for dx in range(2):
                    wk = jnp.zeros((cout, cin), jnp.float32)
                    for ky in fold[(py, dy)]:
                        for kx in fold[(px, dx)]:
                            wk = wk + w[:, :, ky, kx]
                    taps.append(wk)
            phases.append(jnp.stack(taps, axis=0))        # (4, Cout, Cin)
    return jnp.stack(phases, axis=0)                      # (4, 4, Cout, Cin)


def _pick_tile(total, max_tile=16384):
    """Largest lane-aligned (multiple of 128) tile dividing `total`, <= max_tile."""
    if total <= max_tile:
        return total
    t = max_tile - max_tile % 128
    while t >= 128:
        if total % t == 0:
            return t
        t -= 128
    return total


@jax.jit
def up_conv_forward(x_nchw, w_oihw, bias, gamma, beta, eps=1e-5):
    N, Cin, H, W = x_nchw.shape
    Cout = w_oihw.shape[0]
    H2, W2 = 2 * H, 2 * W
    HW, HW2 = H * W, H2 * W2
    Cin_p = ((Cin + 7) // 8) * 8            # align the patch lane / K dim

    # ---- glue: only the ORIGINAL-resolution input is laid out and padded; the
    # ---- 2x-upsampled tensor is never materialized in HBM. ----
    x = jnp.transpose(x_nchw, (0, 2, 3, 1)).astype(jnp.float32)           # NHWC
    xp = jnp.pad(x, ((0, 0), (1, 1), (1, 1), (0, Cin_p - Cin)))           # (N,H+2,W+2,Cin_p)
    wf = _fold_subpixel_weights(w_oihw)                                   # (4,4,Cout,Cin)
    wf = jnp.pad(wf, ((0, 0), (0, 0), (0, 0), (0, Cin_p - Cin)))          # (4,4,Cout,Cin_p)
    b_col = bias.reshape(Cout, 1).astype(jnp.float32)

    # ---- kernel 1: sub-pixel conv + bias + per-image partial BN sums ----
    conv_kernel = functools.partial(_subpixel_conv_kernel, H=H, W=W)
    y_ph, psum, psq = pl.pallas_call(
        conv_kernel,
        out_shape=(jax.ShapeDtypeStruct((N, 2, 2, Cout, HW), jnp.float32),
                   jax.ShapeDtypeStruct((N, Cout, 1), jnp.float32),
                   jax.ShapeDtypeStruct((N, Cout, 1), jnp.float32)),
        grid=(N,),
        in_specs=[pl.BlockSpec((1, H + 2, W + 2, Cin_p), lambda n: (n, 0, 0, 0)),
                  pl.BlockSpec((4, 4, Cout, Cin_p), lambda n: (0, 0, 0, 0)),
                  pl.BlockSpec((Cout, 1), lambda n: (0, 0))],
        out_specs=(pl.BlockSpec((1, 2, 2, Cout, HW), lambda n: (n, 0, 0, 0, 0)),
                   pl.BlockSpec((1, Cout, 1), lambda n: (n, 0, 0)),
                   pl.BlockSpec((1, Cout, 1), lambda n: (n, 0, 0))),
        # Stats are per-step partial sums -> the batch axis can be parallel.
        compiler_params=pltpu.CompilerParams(dimension_semantics=("parallel",)),
    )(xp, wf, b_col)
    # TODO(synk): for very large images add a row-block grid axis with a 1-row
    # halo so double-buffered blocks stay within v7x's 64 MiB VMEM.

    # ---- glue: sub-pixel phase interleave (one fused XLA transpose).
    # TODO(synk): fold this interleave into kernel 1/2 (needs a granularity-1
    # lane/second-minor repack in Mosaic); that would remove one read+write of
    # the conv output.
    y_int = y_ph.reshape(N, 2, 2, Cout, H, W)
    y_int = jnp.transpose(y_int, (0, 3, 4, 1, 5, 2))          # (N, Cout, H, 2, W, 2)
    y_int = y_int.reshape(N, Cout, HW2)                       # NCHW order, spatial flat

    # ---- glue: finalize train-mode BatchNorm stats (biased variance).  Sums
    # were taken on the pre-bias conv output (shifted sums), so mean = mean0 + b
    # and the variance is unaffected by the shift. ----
    cnt = jnp.float32(N * HW2)
    mean0 = psum.sum(axis=0).reshape(Cout) / cnt
    ex2 = psq.sum(axis=0).reshape(Cout) / cnt
    var = jnp.maximum(ex2 - mean0 * mean0, 0.0)
    mean = mean0 + bias.astype(jnp.float32)
    scale = gamma.astype(jnp.float32) * jax.lax.rsqrt(var + eps)
    shift = beta.astype(jnp.float32) - mean * scale
    scale_c = scale.reshape(Cout, 1)
    shift_c = shift.reshape(Cout, 1)

    # ---- kernel 2: fused BN affine + ReLU, lane-dense slabs, in place ----
    TW = _pick_tile(HW2)
    out = pl.pallas_call(
        _bn_relu_kernel,
        out_shape=jax.ShapeDtypeStruct((N, Cout, HW2), jnp.float32),
        grid=(N, HW2 // TW),
        in_specs=[pl.BlockSpec((1, Cout, TW), lambda n, t: (n, 0, t)),
                  pl.BlockSpec((Cout, 1), lambda n, t: (0, 0)),
                  pl.BlockSpec((Cout, 1), lambda n, t: (0, 0))],
        out_specs=pl.BlockSpec((1, Cout, TW), lambda n, t: (n, 0, t)),
        input_output_aliases={0: 0},
        compiler_params=pltpu.CompilerParams(
            dimension_semantics=("parallel", "parallel")),
    )(y_int, scale_c, shift_c)

    return out.reshape(N, Cout, H2, W2)     # metadata-only reshape, already NCHW


def up_conv_reference(x_nchw, w_oihw, bias, gamma, beta, eps=1e-5):
    """Pure-JAX reference mirroring the PyTorch forward (train-mode BN)."""
    xu = jnp.repeat(jnp.repeat(x_nchw, 2, axis=2), 2, axis=3)
    y = jax.lax.conv_general_dilated(
        xu, w_oihw, window_strides=(1, 1), padding=((1, 1), (1, 1)),
        dimension_numbers=("NCHW", "OIHW", "NCHW"))
    y = y + bias[None, :, None, None]
    mean = y.mean(axis=(0, 2, 3), keepdims=True)
    var = y.var(axis=(0, 2, 3), keepdims=True)          # biased, like BN train mode
    yn = (y - mean) * jax.lax.rsqrt(var + eps)
    yn = yn * gamma[None, :, None, None] + beta[None, :, None, None]
    return jnp.maximum(yn, 0.0)


if __name__ == "__main__":
    key = jax.random.PRNGKey(0)
    k_x, k_w, k_b, k_g, k_be = jax.random.split(key, 5)

    N, Cin, Cout, H, W = 2, 4, 8, 16, 16   # output spatial: 32 x 32

    x = jax.random.normal(k_x, (N, Cin, H, W), dtype=jnp.float32)
    w = 0.1 * jax.random.normal(k_w, (Cout, Cin, 3, 3), dtype=jnp.float32)
    b = 0.05 * jax.random.normal(k_b, (Cout,), dtype=jnp.float32)
    gamma = 1.0 + 0.1 * jax.random.normal(k_g, (Cout,), dtype=jnp.float32)
    beta = 0.1 * jax.random.normal(k_be, (Cout,), dtype=jnp.float32)

    out = jax.block_until_ready(up_conv_forward(x, w, b, gamma, beta))
    ref = jax.block_until_ready(up_conv_reference(x, w, b, gamma, beta))
    np.testing.assert_allclose(np.asarray(out), np.asarray(ref), rtol=1e-4, atol=1e-4)

    print("KERNEL_OK")
</pallas_src>

<mosaic_0001>
module attributes {stable_mosaic.version = 11 : i64} {
  func.func @_subpixel_conv_kernel(%arg0: i32, %arg1: memref<1x18x18x8xf32, #tpu.memory_space<vmem>>, %arg2: memref<4x4x8x8xf32, #tpu.memory_space<vmem>>, %arg3: memref<8x1xf32, #tpu.memory_space<vmem>>, %arg4: memref<1x2x2x8x256xf32, #tpu.memory_space<vmem>>, %arg5: memref<1x8x1xf32, #tpu.memory_space<vmem>>, %arg6: memref<1x8x1xf32, #tpu.memory_space<vmem>>) attributes {dimension_semantics = [#tpu.dimension_semantics<parallel>], iteration_bounds = array<i64: 2>, scalar_prefetch = 0 : i64, scratch_operands = 0 : i64, tpu.core_type = #tpu.core_type<tc>, window_params = [{transform_indices = @transform_0, window_bounds = array<i64: 1, 18, 18, 8>}, {pipeline_mode = #tpu.pipeline_mode<synchronous>, transform_indices = @transform_1, window_bounds = array<i64: 4, 4, 8, 8>}, {pipeline_mode = #tpu.pipeline_mode<synchronous>, transform_indices = @transform_2, window_bounds = array<i64: 8, 1>}, {transform_indices = @transform_3, window_bounds = array<i64: 1, 2, 2, 8, 256>}, {transform_indices = @transform_4, window_bounds = array<i64: 1, 8, 1>}, {transform_indices = @transform_5, window_bounds = array<i64: 1, 8, 1>}]} {
    %c0 = arith.constant 0 : index
    %c0_0 = arith.constant 0 : index
    %c0_1 = arith.constant 0 : index
    %c0_2 = arith.constant 0 : index
    %0 = vector.load %arg1[%c0, %c0_0, %c0_1, %c0_2] : memref<1x18x18x8xf32, #tpu.memory_space<vmem>>, vector<1x18x18x8xf32>
    %1 = vector.shape_cast %0 : vector<1x18x18x8xf32> to vector<18x18x8xf32>
    %c0_3 = arith.constant 0 : index
    %c0_4 = arith.constant 0 : index
    %2 = vector.load %arg3[%c0_3, %c0_4] : memref<8x1xf32, #tpu.memory_space<vmem>>, vector<8x1xf32>
    %cst = arith.constant 0.000000e+00 : f32
    %3 = vector.broadcast %cst : f32 to vector<8x1xf32>
    %cst_5 = arith.constant 0.000000e+00 : f32
    %4 = vector.broadcast %cst_5 : f32 to vector<8x1xf32>
    %cst_6 = arith.constant 0.000000e+00 : f32
    %5 = vector.broadcast %cst_6 : f32 to vector<8x256xf32>
    %6 = vector.extract_strided_slice %1 {offsets = [0, 0, 0], sizes = [16, 16, 8], strides = [1, 1, 1]} : vector<18x18x8xf32> to vector<16x16x8xf32>
    %7 = vector.shape_cast %6 : vector<16x16x8xf32> to vector<256x8xf32>
    %c0_7 = arith.constant 0 : index
    %c0_8 = arith.constant 0 : index
    %c0_9 = arith.constant 0 : index
    %c0_10 = arith.constant 0 : index
    %8 = vector.load %arg2[%c0_7, %c0_8, %c0_9, %c0_10] : memref<4x4x8x8xf32, #tpu.memory_space<vmem>>, vector<1x1x8x8xf32>
    %9 = vector.shape_cast %8 : vector<1x1x8x8xf32> to vector<8x8xf32>
    %cst_11 = arith.constant dense<0.000000e+00> : vector<8x256xf32>
    %10 = tpu.matmul %9, %7, %cst_11 {dimension_numbers = #tpu.dot_dimension_numbers<[1], [1], [0], [0], [0, 0, 1, 0], [], []>} : vector<8x8xf32>, vector<256x8xf32>, vector<8x256xf32> -> vector<8x256xf32>
    %11 = arith.addf %5, %10 : vector<8x256xf32>
    %12 = vector.extract_strided_slice %1 {offsets = [0, 1, 0], sizes = [16, 16, 8], strides = [1, 1, 1]} : vector<18x18x8xf32> to vector<16x16x8xf32>
    %13 = vector.shape_cast %12 : vector<16x16x8xf32> to vector<256x8xf32>
    %c0_12 = arith.constant 0 : index
    %c1 = arith.constant 1 : index
    %c0_13 = arith.constant 0 : index
    %c0_14 = arith.constant 0 : index
    %14 = vector.load %arg2[%c0_12, %c1, %c0_13, %c0_14] : memref<4x4x8x8xf32, #tpu.memory_space<vmem>>, vector<1x1x8x8xf32>
    %15 = vector.shape_cast %14 : vector<1x1x8x8xf32> to vector<8x8xf32>
    %cst_15 = arith.constant dense<0.000000e+00> : vector<8x256xf32>
    %16 = tpu.matmul %15, %13, %cst_15 {dimension_numbers = #tpu.dot_dimension_numbers<[1], [1], [0], [0], [0, 0, 1, 0], [], []>} : vector<8x8xf32>, vector<256x8xf32>, vector<8x256xf32> -> vector<8x256xf32>
    %17 = arith.addf %11, %16 : vector<8x256xf32>
    %18 = vector.extract_strided_slice %1 {offsets = [1, 0, 0], sizes = [16, 16, 8], strides = [1, 1, 1]} : vector<18x18x8xf32> to vector<16x16x8xf32>
    %19 = vector.shape_cast %18 : vector<16x16x8xf32> to vector<256x8xf32>
    %c0_16 = arith.constant 0 : index
    %c2 = arith.constant 2 : index
    %c0_17 = arith.constant 0 : index
    %c0_18 = arith.constant 0 : index
    %20 = vector.load %arg2[%c0_16, %c2, %c0_17, %c0_18] : memref<4x4x8x8xf32, #tpu.memory_space<vmem>>, vector<1x1x8x8xf32>
    %21 = vector.shape_cast %20 : vector<1x1x8x8xf32> to vector<8x8xf32>
    %cst_19 = arith.constant dense<0.000000e+00> : vector<8x256xf32>
    %22 = tpu.matmul %21, %19, %cst_19 {dimension_numbers = #tpu.dot_dimension_numbers<[1], [1], [0], [0], [0, 0, 1, 0], [], []>} : vector<8x8xf32>, vector<256x8xf32>, vector<8x256xf32> -> vector<8x256xf32>
    %23 = arith.addf %17, %22 : vector<8x256xf32>
    %24 = vector.extract_strided_slice %1 {offsets = [1, 1, 0], sizes = [16, 16, 8], strides = [1, 1, 1]} : vector<18x18x8xf32> to vector<16x16x8xf32>
    %25 = vector.shape_cast %24 : vector<16x16x8xf32> to vector<256x8xf32>
    %c0_20 = arith.constant 0 : index
    %c3 = arith.constant 3 : index
    %c0_21 = arith.constant 0 : index
    %c0_22 = arith.constant 0 : index
    %26 = vector.load %arg2[%c0_20, %c3, %c0_21, %c0_22] : memref<4x4x8x8xf32, #tpu.memory_space<vmem>>, vector<1x1x8x8xf32>
    %27 = vector.shape_cast %26 : vector<1x1x8x8xf32> to vector<8x8xf32>
    %cst_23 = arith.constant dense<0.000000e+00> : vector<8x256xf32>
    %28 = tpu.matmul %27, %25, %cst_23 {dimension_numbers = #tpu.dot_dimension_numbers<[1], [1], [0], [0], [0, 0, 1, 0], [], []>} : vector<8x8xf32>, vector<256x8xf32>, vector<8x256xf32> -> vector<8x256xf32>
    %29 = arith.addf %23, %28 : vector<8x256xf32>
    %cst_24 = arith.constant dense<0.000000e+00> : vector<8xf32>
    %30 = vector.multi_reduction <add>, %29, %cst_24 [1] : vector<8x256xf32> to vector<8xf32>
    %31 = vector.shape_cast %30 : vector<8xf32> to vector<8x1xf32>
    %32 = arith.addf %3, %31 : vector<8x1xf32>
    %33 = arith.mulf %29, %29 : vector<8x256xf32>
    %cst_25 = arith.constant dense<0.000000e+00> : vector<8xf32>
    %34 = vector.multi_reduction <add>, %33, %cst_25 [1] : vector<8x256xf32> to vector<8xf32>
    %35 = vector.shape_cast %34 : vector<8xf32> to vector<8x1xf32>
    %36 = arith.addf %4, %35 : vector<8x1xf32>
    %37 = vector.broadcast %2 : vector<8x1xf32> to vector<8x256xf32>
    %38 = arith.addf %29, %37 : vector<8x256xf32>
    %c0_26 = arith.constant 0 : index
    %c0_27 = arith.constant 0 : index
    %c0_28 = arith.constant 0 : index
    %c0_29 = arith.constant 0 : index
    %c0_30 = arith.constant 0 : index
    %39 = vector.load %arg4[%c0_26, %c0_27, %c0_28, %c0_29, %c0_30] : memref<1x2x2x8x256xf32, #tpu.memory_space<vmem>>, vector<1x1x1x8x256xf32>
    %40 = vector.shape_cast %39 : vector<1x1x1x8x256xf32> to vector<8x256xf32>
    %41 = vector.shape_cast %38 : vector<8x256xf32> to vector<1x1x1x8x256xf32>
    tpu.vector_store %arg4[%c0_26, %c0_27, %c0_28, %c0_29, %c0_30], %41 {strides = array<i32>} : memref<1x2x2x8x256xf32, #tpu.memory_space<vmem>>, vector<1x1x1x8x256xf32>,
    %cst_31 = arith.constant 0.000000e+00 : f32
    %42 = vector.broadcast %cst_31 : f32 to vector<8x256xf32>
    %43 = vector.extract_strided_slice %1 {offsets = [0, 1, 0], sizes = [16, 16, 8], strides = [1, 1, 1]} : vector<18x18x8xf32> to vector<16x16x8xf32>
    %44 = vector.shape_cast %43 : vector<16x16x8xf32> to vector<256x8xf32>
    %c1_32 = arith.constant 1 : index
    %c0_33 = arith.constant 0 : index
    %c0_34 = arith.constant 0 : index
    %c0_35 = arith.constant 0 : index
    %45 = vector.load %arg2[%c1_32, %c0_33, %c0_34, %c0_35] : memref<4x4x8x8xf32, #tpu.memory_space<vmem>>, vector<1x1x8x8xf32>
    %46 = vector.shape_cast %45 : vector<1x1x8x8xf32> to vector<8x8xf32>
    %cst_36 = arith.constant dense<0.000000e+00> : vector<8x256xf32>
    %47 = tpu.matmul %46, %44, %cst_36 {dimension_numbers = #tpu.dot_dimension_numbers<[1], [1], [0], [0], [0, 0, 1, 0], [], []>} : vector<8x8xf32>, vector<256x8xf32>, vector<8x256xf32> -> vector<8x256xf32>
    %48 = arith.addf %42, %47 : vector<8x256xf32>
    %49 = vector.extract_strided_slice %1 {offsets = [0, 2, 0], sizes = [16, 16, 8], strides = [1, 1, 1]} : vector<18x18x8xf32> to vector<16x16x8xf32>
    %50 = vector.shape_cast %49 : vector<16x16x8xf32> to vector<256x8xf32>
    %c1_37 = arith.constant 1 : index
    %c1_38 = arith.constant 1 : index
    %c0_39 = arith.constant 0 : index
    %c0_40 = arith.constant 0 : index
    %51 = vector.load %arg2[%c1_37, %c1_38, %c0_39, %c0_40] : memref<4x4x8x8xf32, #tpu.memory_space<vmem>>, vector<1x1x8x8xf32>
    %52 = vector.shape_cast %51 : vector<1x1x8x8xf32> to vector<8x8xf32>
    %cst_41 = arith.constant dense<0.000000e+00> : vector<8x256xf32>
    %53 = tpu.matmul %52, %50, %cst_41 {dimension_numbers = #tpu.dot_dimension_numbers<[1], [1], [0], [0], [0, 0, 1, 0], [], []>} : vector<8x8xf32>, vector<256x8xf32>, vector<8x256xf32> -> vector<8x256xf32>
    %54 = arith.addf %48, %53 : vector<8x256xf32>
    %55 = vector.extract_strided_slice %1 {offsets = [1, 1, 0], sizes = [16, 16, 8], strides = [1, 1, 1]} : vector<18x18x8xf32> to vector<16x16x8xf32>
    %56 = vector.shape_cast %55 : vector<16x16x8xf32> to vector<256x8xf32>
    %c1_42 = arith.constant 1 : index
    %c2_43 = arith.constant 2 : index
    %c0_44 = arith.constant 0 : index
    %c0_45 = arith.constant 0 : index
    %57 = vector.load %arg2[%c1_42, %c2_43, %c0_44, %c0_45] : memref<4x4x8x8xf32, #tpu.memory_space<vmem>>, vector<1x1x8x8xf32>
    %58 = vector.shape_cast %57 : vector<1x1x8x8xf32> to vector<8x8xf32>
    %cst_46 = arith.constant dense<0.000000e+00> : vector<8x256xf32>
    %59 = tpu.matmul %58, %56, %cst_46 {dimension_numbers = #tpu.dot_dimension_numbers<[1], [1], [0], [0], [0, 0, 1, 0], [], []>} : vector<8x8xf32>, vector<256x8xf32>, vector<8x256xf32> -> vector<8x256xf32>
    %60 = arith.addf %54, %59 : vector<8x256xf32>
    %61 = vector.extract_strided_slice %1 {offsets = [1, 2, 0], sizes = [16, 16, 8], strides = [1, 1, 1]} : vector<18x18x8xf32> to vector<16x16x8xf32>
    %62 = vector.shape_cast %61 : vector<16x16x8xf32> to vector<256x8xf32>
    %c1_47 = arith.constant 1 : index
    %c3_48 = arith.constant 3 : index
    %c0_49 = arith.constant 0 : index
    %c0_50 = arith.constant 0 : index
    %63 = vector.load %arg2[%c1_47, %c3_48, %c0_49, %c0_50] : memref<4x4x8x8xf32, #tpu.memory_space<vmem>>, vector<1x1x8x8xf32>
    %64 = vector.shape_cast %63 : vector<1x1x8x8xf32> to vector<8x8xf32>
    %cst_51 = arith.constant dense<0.000000e+00> : vector<8x256xf32>
    %65 = tpu.matmul %64, %62, %cst_51 {dimension_numbers = #tpu.dot_dimension_numbers<[1], [1], [0], [0], [0, 0, 1, 0], [], []>} : vector<8x8xf32>, vector<256x8xf32>, vector<8x256xf32> -> vector<8x256xf32>
    %66 = arith.addf %60, %65 : vector<8x256xf32>
    %cst_52 = arith.constant dense<0.000000e+00> : vector<8xf32>
    %67 = vector.multi_reduction <add>, %66, %cst_52 [1] : vector<8x256xf32> to vector<8xf32>
    %68 = vector.shape_cast %67 : vector<8xf32> to vector<8x1xf32>
    %69 = arith.addf %32, %68 : vector<8x1xf32>
    %70 = arith.mulf %66, %66 : vector<8x256xf32>
    %cst_53 = arith.constant dense<0.000000e+00> : vector<8xf32>
    %71 = vector.multi_reduction <add>, %70, %cst_53 [1] : vector<8x256xf32> to vector<8xf32>
    %72 = vector.shape_cast %71 : vector<8xf32> to vector<8x1xf32>
    %73 = arith.addf %36, %72 : vector<8x1xf32>
    %74 = vector.broadcast %2 : vector<8x1xf32> to vector<8x256xf32>
    %75 = arith.addf %66, %74 : vector<8x256xf32>
    %c0_54 = arith.constant 0 : index
    %c0_55 = arith.constant 0 : index
    %c1_56 = arith.constant 1 : index
    %c0_57 = arith.constant 0 : index
    %c0_58 = arith.constant 0 : index
    %76 = vector.load %arg4[%c0_54, %c0_55, %c1_56, %c0_57, %c0_58] : memref<1x2x2x8x256xf32, #tpu.memory_space<vmem>>, vector<1x1x1x8x256xf32>
    %77 = vector.shape_cast %76 : vector<1x1x1x8x256xf32> to vector<8x256xf32>
    %78 = vector.shape_cast %75 : vector<8x256xf32> to vector<1x1x1x8x256xf32>
    tpu.vector_store %arg4[%c0_54, %c0_55, %c1_56, %c0_57, %c0_58], %78 {strides = array<i32>} : memref<1x2x2x8x256xf32, #tpu.memory_space<vmem>>, vector<1x1x1x8x256xf32>,
    %cst_59 = arith.constant 0.000000e+00 : f32
    %79 = vector.broadcast %cst_59 : f32 to vector<8x256xf32>
    %80 = vector.extract_strided_slice %1 {offsets = [1, 0, 0], sizes = [16, 16, 8], strides = [1, 1, 1]} : vector<18x18x8xf32> to vector<16x16x8xf32>
    %81 = vector.shape_cast %80 : vector<16x16x8xf32> to vector<256x8xf32>
    %c2_60 = arith.constant 2 : index
    %c0_61 = arith.constant 0 : index
    %c0_62 = arith.constant 0 : index
    %c0_63 = arith.constant 0 : index
    %82 = vector.load %arg2[%c2_60, %c0_61, %c0_62, %c0_63] : memref<4x4x8x8xf32, #tpu.memory_space<vmem>>, vector<1x1x8x8xf32>
    %83 = vector.shape_cast %82 : vector<1x1x8x8xf32> to vector<8x8xf32>
    %cst_64 = arith.constant dense<0.000000e+00> : vector<8x256xf32>
    %84 = tpu.matmul %83, %81, %cst_64 {dimension_numbers = #tpu.dot_dimension_numbers<[1], [1], [0], [0], [0, 0, 1, 0], [], []>} : vector<8x8xf32>, vector<256x8xf32>, vector<8x256xf32> -> vector<8x256xf32>
    %85 = arith.addf %79, %84 : vector<8x256xf32>
    %86 = vector.extract_strided_slice %1 {offsets = [1, 1, 0], sizes = [16, 16, 8], strides = [1, 1, 1]} : vector<18x18x8xf32> to vector<16x16x8xf32>
    %87 = vector.shape_cast %86 : vector<16x16x8xf32> to vector<256x8xf32>
    %c2_65 = arith.constant 2 : index
    %c1_66 = arith.constant 1 : index
    %c0_67 = arith.constant 0 : index
    %c0_68 = arith.constant 0 : index
    %88 = vector.load %arg2[%c2_65, %c1_66, %c0_67, %c0_68] : memref<4x4x8x8xf32, #tpu.memory_space<vmem>>, vector<1x1x8x8xf32>
    %89 = vector.shape_cast %88 : vector<1x1x8x8xf32> to vector<8x8xf32>
    %cst_69 = arith.constant dense<0.000000e+00> : vector<8x256xf32>
    %90 = tpu.matmul %89, %87, %cst_69 {dimension_numbers = #tpu.dot_dimension_numbers<[1], [1], [0], [0], [0, 0, 1, 0], [], []>} : vector<8x8xf32>, vector<256x8xf32>, vector<8x256xf32> -> vector<8x256xf32>
    %91 = arith.addf %85, %90 : vector<8x256xf32>
    %92 = vector.extract_strided_slice %1 {offsets = [2, 0, 0], sizes = [16, 16, 8], strides = [1, 1, 1]} : vector<18x18x8xf32> to vector<16x16x8xf32>
    %93 = vector.shape_cast %92 : vector<16x16x8xf32> to vector<256x8xf32>
    %c2_70 = arith.constant 2 : index
    %c2_71 = arith.constant 2 : index
    %c0_72 = arith.constant 0 : index
    %c0_73 = arith.constant 0 : index
    %94 = vector.load %arg2[%c2_70, %c2_71, %c0_72, %c0_73] : memref<4x4x8x8xf32, #tpu.memory_space<vmem>>, vector<1x1x8x8xf32>
    %95 = vector.shape_cast %94 : vector<1x1x8x8xf32> to vector<8x8xf32>
    %cst_74 = arith.constant dense<0.000000e+00> : vector<8x256xf32>
    %96 = tpu.matmul %95, %93, %cst_74 {dimension_numbers = #tpu.dot_dimension_numbers<[1], [1], [0], [0], [0, 0, 1, 0], [], []>} : vector<8x8xf32>, vector<256x8xf32>, vector<8x256xf32> -> vector<8x256xf32>
    %97 = arith.addf %91, %96 : vector<8x256xf32>
    %98 = vector.extract_strided_slice %1 {offsets = [2, 1, 0], sizes = [16, 16, 8], strides = [1, 1, 1]} : vector<18x18x8xf32> to vector<16x16x8xf32>
    %99 = vector.shape_cast %98 : vector<16x16x8xf32> to vector<256x8xf32>
    %c2_75 = arith.constant 2 : index
    %c3_76 = arith.constant 3 : index
    %c0_77 = arith.constant 0 : index
    %c0_78 = arith.constant 0 : index
    %100 = vector.load %arg2[%c2_75, %c3_76, %c0_77, %c0_78] : memref<4x4x8x8xf32, #tpu.memory_space<vmem>>, vector<1x1x8x8xf32>
    %101 = vector.shape_cast %100 : vector<1x1x8x8xf32> to vector<8x8xf32>
    %cst_79 = arith.constant dense<0.000000e+00> : vector<8x256xf32>
    %102 = tpu.matmul %101, %99, %cst_79 {dimension_numbers = #tpu.dot_dimension_numbers<[1], [1], [0], [0], [0, 0, 1, 0], [], []>} : vector<8x8xf32>, vector<256x8xf32>, vector<8x256xf32> -> vector<8x256xf32>
    %103 = arith.addf %97, %102 : vector<8x256xf32>
    %cst_80 = arith.constant dense<0.000000e+00> : vector<8xf32>
    %104 = vector.multi_reduction <add>, %103, %cst_80 [1] : vector<8x256xf32> to vector<8xf32>
    %105 = vector.shape_cast %104 : vector<8xf32> to vector<8x1xf32>
    %106 = arith.addf %69, %105 : vector<8x1xf32>
    %107 = arith.mulf %103, %103 : vector<8x256xf32>
    %cst_81 = arith.constant dense<0.000000e+00> : vector<8xf32>
    %108 = vector.multi_reduction <add>, %107, %cst_81 [1] : vector<8x256xf32> to vector<8xf32>
    %109 = vector.shape_cast %108 : vector<8xf32> to vector<8x1xf32>
    %110 = arith.addf %73, %109 : vector<8x1xf32>
    %111 = vector.broadcast %2 : vector<8x1xf32> to vector<8x256xf32>
    %112 = arith.addf %103, %111 : vector<8x256xf32>
    %c0_82 = arith.constant 0 : index
    %c1_83 = arith.constant 1 : index
    %c0_84 = arith.constant 0 : index
    %c0_85 = arith.constant 0 : index
    %c0_86 = arith.constant 0 : index
    %113 = vector.load %arg4[%c0_82, %c1_83, %c0_84, %c0_85, %c0_86] : memref<1x2x2x8x256xf32, #tpu.memory_space<vmem>>, vector<1x1x1x8x256xf32>
    %114 = vector.shape_cast %113 : vector<1x1x1x8x256xf32> to vector<8x256xf32>
    %115 = vector.shape_cast %112 : vector<8x256xf32> to vector<1x1x1x8x256xf32>
    tpu.vector_store %arg4[%c0_82, %c1_83, %c0_84, %c0_85, %c0_86], %115 {strides = array<i32>} : memref<1x2x2x8x256xf32, #tpu.memory_space<vmem>>, vector<1x1x1x8x256xf32>,
    %cst_87 = arith.constant 0.000000e+00 : f32
    %116 = vector.broadcast %cst_87 : f32 to vector<8x256xf32>
    %117 = vector.extract_strided_slice %1 {offsets = [1, 1, 0], sizes = [16, 16, 8], strides = [1, 1, 1]} : vector<18x18x8xf32> to vector<16x16x8xf32>
    %118 = vector.shape_cast %117 : vector<16x16x8xf32> to vector<256x8xf32>
    %c3_88 = arith.constant 3 : index
    %c0_89 = arith.constant 0 : index
    %c0_90 = arith.constant 0 : index
    %c0_91 = arith.constant 0 : index
    %119 = vector.load %arg2[%c3_88, %c0_89, %c0_90, %c0_91] : memref<4x4x8x8xf32, #tpu.memory_space<vmem>>, vector<1x1x8x8xf32>
    %120 = vector.shape_cast %119 : vector<1x1x8x8xf32> to vector<8x8xf32>
    %cst_92 = arith.constant dense<0.000000e+00> : vector<8x256xf32>
    %121 = tpu.matmul %120, %118, %cst_92 {dimension_numbers = #tpu.dot_dimension_numbers<[1], [1], [0], [0], [0, 0, 1, 0], [], []>} : vector<8x8xf32>, vector<256x8xf32>, vector<8x256xf32> -> vector<8x256xf32>
    %122 = arith.addf %116, %121 : vector<8x256xf32>
    %123 = vector.extract_strided_slice %1 {offsets = [1, 2, 0], sizes = [16, 16, 8], strides = [1, 1, 1]} : vector<18x18x8xf32> to vector<16x16x8xf32>
    %124 = vector.shape_cast %123 : vector<16x16x8xf32> to vector<256x8xf32>
    %c3_93 = arith.constant 3 : index
    %c1_94 = arith.constant 1 : index
    %c0_95 = arith.constant 0 : index
    %c0_96 = arith.constant 0 : index
    %125 = vector.load %arg2[%c3_93, %c1_94, %c0_95, %c0_96] : memref<4x4x8x8xf32, #tpu.memory_space<vmem>>, vector<1x1x8x8xf32>
    %126 = vector.shape_cast %125 : vector<1x1x8x8xf32> to vector<8x8xf32>
    %cst_97 = arith.constant dense<0.000000e+00> : vector<8x256xf32>
    %127 = tpu.matmul %126, %124, %cst_97 {dimension_numbers = #tpu.dot_dimension_numbers<[1], [1], [0], [0], [0, 0, 1, 0], [], []>} : vector<8x8xf32>, vector<256x8xf32>, vector<8x256xf32> -> vector<8x256xf32>
    %128 = arith.addf %122, %127 : vector<8x256xf32>
    %129 = vector.extract_strided_slice %1 {offsets = [2, 1, 0], sizes = [16, 16, 8], strides = [1, 1, 1]} : vector<18x18x8xf32> to vector<16x16x8xf32>
    %130 = vector.shape_cast %129 : vector<16x16x8xf32> to vector<256x8xf32>
    %c3_98 = arith.constant 3 : index
    %c2_99 = arith.constant 2 : index
    %c0_100 = arith.constant 0 : index
    %c0_101 = arith.constant 0 : index
    %131 = vector.load %arg2[%c3_98, %c2_99, %c0_100, %c0_101] : memref<4x4x8x8xf32, #tpu.memory_space<vmem>>, vector<1x1x8x8xf32>
    %132 = vector.shape_cast %131 : vector<1x1x8x8xf32> to vector<8x8xf32>
    %cst_102 = arith.constant dense<0.000000e+00> : vector<8x256xf32>
    %133 = tpu.matmul %132, %130, %cst_102 {dimension_numbers = #tpu.dot_dimension_numbers<[1], [1], [0], [0], [0, 0, 1, 0], [], []>} : vector<8x8xf32>, vector<256x8xf32>, vector<8x256xf32> -> vector<8x256xf32>
    %134 = arith.addf %128, %133 : vector<8x256xf32>
    %135 = vector.extract_strided_slice %1 {offsets = [2, 2, 0], sizes = [16, 16, 8], strides = [1, 1, 1]} : vector<18x18x8xf32> to vector<16x16x8xf32>
    %136 = vector.shape_cast %135 : vector<16x16x8xf32> to vector<256x8xf32>
    %c3_103 = arith.constant 3 : index
    %c3_104 = arith.constant 3 : index
    %c0_105 = arith.constant 0 : index
    %c0_106 = arith.constant 0 : index
    %137 = vector.load %arg2[%c3_103, %c3_104, %c0_105, %c0_106] : memref<4x4x8x8xf32, #tpu.memory_space<vmem>>, vector<1x1x8x8xf32>
    %138 = vector.shape_cast %137 : vector<1x1x8x8xf32> to vector<8x8xf32>
    %cst_107 = arith.constant dense<0.000000e+00> : vector<8x256xf32>
    %139 = tpu.matmul %138, %136, %cst_107 {dimension_numbers = #tpu.dot_dimension_numbers<[1], [1], [0], [0], [0, 0, 1, 0], [], []>} : vector<8x8xf32>, vector<256x8xf32>, vector<8x256xf32> -> vector<8x256xf32>
    %140 = arith.addf %134, %139 : vector<8x256xf32>
    %cst_108 = arith.constant dense<0.000000e+00> : vector<8xf32>
    %141 = vector.multi_reduction <add>, %140, %cst_108 [1] : vector<8x256xf32> to vector<8xf32>
    %142 = vector.shape_cast %141 : vector<8xf32> to vector<8x1xf32>
    %143 = arith.addf %106, %142 : vector<8x1xf32>
    %144 = arith.mulf %140, %140 : vector<8x256xf32>
    %cst_109 = arith.constant dense<0.000000e+00> : vector<8xf32>
    %145 = vector.multi_reduction <add>, %144, %cst_109 [1] : vector<8x256xf32> to vector<8xf32>
    %146 = vector.shape_cast %145 : vector<8xf32> to vector<8x1xf32>
    %147 = arith.addf %110, %146 : vector<8x1xf32>
    %148 = vector.broadcast %2 : vector<8x1xf32> to vector<8x256xf32>
    %149 = arith.addf %140, %148 : vector<8x256xf32>
    %c0_110 = arith.constant 0 : index
    %c1_111 = arith.constant 1 : index
    %c1_112 = arith.constant 1 : index
    %c0_113 = arith.constant 0 : index
    %c0_114 = arith.constant 0 : index
    %150 = vector.load %arg4[%c0_110, %c1_111, %c1_112, %c0_113, %c0_114] : memref<1x2x2x8x256xf32, #tpu.memory_space<vmem>>, vector<1x1x1x8x256xf32>
    %151 = vector.shape_cast %150 : vector<1x1x1x8x256xf32> to vector<8x256xf32>
    %152 = vector.shape_cast %149 : vector<8x256xf32> to vector<1x1x1x8x256xf32>
    tpu.vector_store %arg4[%c0_110, %c1_111, %c1_112, %c0_113, %c0_114], %152 {strides = array<i32>} : memref<1x2x2x8x256xf32, #tpu.memory_space<vmem>>, vector<1x1x1x8x256xf32>,
    %153 = vector.shape_cast %143 : vector<8x1xf32> to vector<1x8x1xf32>
    %c0_115 = arith.constant 0 : index
    %c0_116 = arith.constant 0 : index
    %c0_117 = arith.constant 0 : index
    %154 = vector.load %arg5[%c0_115, %c0_116, %c0_117] : memref<1x8x1xf32, #tpu.memory_space<vmem>>, vector<1x8x1xf32>
    tpu.vector_store %arg5[%c0_115, %c0_116, %c0_117], %153 {strides = array<i32>} : memref<1x8x1xf32, #tpu.memory_space<vmem>>, vector<1x8x1xf32>,
    %155 = vector.shape_cast %147 : vector<8x1xf32> to vector<1x8x1xf32>
    %c0_118 = arith.constant 0 : index
    %c0_119 = arith.constant 0 : index
    %c0_120 = arith.constant 0 : index
    %156 = vector.load %arg6[%c0_118, %c0_119, %c0_120] : memref<1x8x1xf32, #tpu.memory_space<vmem>>, vector<1x8x1xf32>
    tpu.vector_store %arg6[%c0_118, %c0_119, %c0_120], %155 {strides = array<i32>} : memref<1x8x1xf32, #tpu.memory_space<vmem>>, vector<1x8x1xf32>,
    return
  }
  func.func @transform_0(%arg0: i32) -> (i32, i32, i32, i32) {
    %c0_i32 = arith.constant 0 : i32
    %c0_i32_0 = arith.constant 0 : i32
    %c0_i32_1 = arith.constant 0 : i32
    %c0_i32_2 = arith.constant 0 : i32
    return %arg0, %c0_i32, %c0_i32_0, %c0_i32_1 : i32, i32, i32, i32
  }
  func.func @transform_1(%arg0: i32) -> (i32, i32, i32, i32) {
    %c0_i32 = arith.constant 0 : i32
    %c0_i32_0 = arith.constant 0 : i32
    %c0_i32_1 = arith.constant 0 : i32
    %c0_i32_2 = arith.constant 0 : i32
    %c0_i32_3 = arith.constant 0 : i32
    return %c0_i32, %c0_i32_0, %c0_i32_1, %c0_i32_2 : i32, i32, i32, i32
  }
  func.func @transform_2(%arg0: i32) -> (i32, i32) {
    %c0_i32 = arith.constant 0 : i32
    %c0_i32_0 = arith.constant 0 : i32
    %c0_i32_1 = arith.constant 0 : i32
    return %c0_i32, %c0_i32_0 : i32, i32
  }
  func.func @transform_3(%arg0: i32) -> (i32, i32, i32, i32, i32) {
    %c0_i32 = arith.constant 0 : i32
    %c0_i32_0 = arith.constant 0 : i32
    %c0_i32_1 = arith.constant 0 : i32
    %c0_i32_2 = arith.constant 0 : i32
    %c0_i32_3 = arith.constant 0 : i32
    return %arg0, %c0_i32, %c0_i32_0, %c0_i32_1, %c0_i32_2 : i32, i32, i32, i32, i32
  }
  func.func @transform_4(%arg0: i32) -> (i32, i32, i32) {
    %c0_i32 = arith.constant 0 : i32
    %c0_i32_0 = arith.constant 0 : i32
    %c0_i32_1 = arith.constant 0 : i32
    return %arg0, %c0_i32, %c0_i32_0 : i32, i32, i32
  }
  func.func @transform_5(%arg0: i32) -> (i32, i32, i32) {
    %c0_i32 = arith.constant 0 : i32
    %c0_i32_0 = arith.constant 0 : i32
    %c0_i32_1 = arith.constant 0 : i32
    return %arg0, %c0_i32, %c0_i32_0 : i32, i32, i32
  }
}

module attributes {stable_mosaic.version = 11 : i64} {
  func.func @_bn_relu_kernel(%arg0: i32, %arg1: i32, %arg2: memref<1x8x1024xf32, #tpu.memory_space<vmem>>, %arg3: memref<8x1xf32, #tpu.memory_space<vmem>>, %arg4: memref<8x1xf32, #tpu.memory_space<vmem>>, %arg5: memref<1x8x1024xf32, #tpu.memory_space<vmem>>) attributes {dimension_semantics = [#tpu.dimension_semantics<parallel>, #tpu.dimension_semantics<parallel>], iteration_bounds = array<i64: 2, 1>, scalar_prefetch = 0 : i64, scratch_operands = 0 : i64, tpu.core_type = #tpu.core_type<tc>, window_params = [{transform_indices = @transform_0, window_bounds = array<i64: 1, 8, 1024>}, {pipeline_mode = #tpu.pipeline_mode<synchronous>, transform_indices = @transform_1, window_bounds = array<i64: 8, 1>}, {pipeline_mode = #tpu.pipeline_mode<synchronous>, transform_indices = @transform_2, window_bounds = array<i64: 8, 1>}, {transform_indices = @transform_3, window_bounds = array<i64: 1, 8, 1024>}]} {
    %c0 = arith.constant 0 : index
    %c0_0 = arith.constant 0 : index
    %c0_1 = arith.constant 0 : index
    %0 = vector.load %arg2[%c0, %c0_0, %c0_1] : memref<1x8x1024xf32, #tpu.memory_space<vmem>>, vector<1x8x1024xf32>
    %c0_2 = arith.constant 0 : index
    %c0_3 = arith.constant 0 : index
    %1 = vector.load %arg3[%c0_2, %c0_3] : memref<8x1xf32, #tpu.memory_space<vmem>>, vector<8x1xf32>
    %2 = vector.shape_cast %1 : vector<8x1xf32> to vector<1x8x1xf32>
    %3 = vector.broadcast %2 : vector<1x8x1xf32> to vector<1x8x1024xf32>
    %4 = arith.mulf %0, %3 : vector<1x8x1024xf32>
    %c0_4 = arith.constant 0 : index
    %c0_5 = arith.constant 0 : index
    %5 = vector.load %arg4[%c0_4, %c0_5] : memref<8x1xf32, #tpu.memory_space<vmem>>, vector<8x1xf32>
    %6 = vector.shape_cast %5 : vector<8x1xf32> to vector<1x8x1xf32>
    %7 = vector.broadcast %6 : vector<1x8x1xf32> to vector<1x8x1024xf32>
    %8 = arith.addf %4, %7 : vector<1x8x1024xf32>
    %cst = arith.constant 0.000000e+00 : f32
    %9 = vector.broadcast %cst : f32 to vector<1x8x1024xf32>
    %10 = arith.maximumf %8, %9 : vector<1x8x1024xf32>
    %c0_6 = arith.constant 0 : index
    %c0_7 = arith.constant 0 : index
    %c0_8 = arith.constant 0 : index
    %11 = vector.load %arg5[%c0_6, %c0_7, %c0_8] : memref<1x8x1024xf32, #tpu.memory_space<vmem>>, vector<1x8x1024xf32>
    tpu.vector_store %arg5[%c0_6, %c0_7, %c0_8], %10 {strides = array<i32>} : memref<1x8x1024xf32, #tpu.memory_space<vmem>>, vector<1x8x1024xf32>,
    return
  }
  func.func @transform_0(%arg0: i32, %arg1: i32) -> (i32, i32, i32) {
    %c0_i32 = arith.constant 0 : i32
    %c0_i32_0 = arith.constant 0 : i32
    return %arg0, %c0_i32, %arg1 : i32, i32, i32
  }
  func.func @transform_1(%arg0: i32, %arg1: i32) -> (i32, i32) {
    %c0_i32 = arith.constant 0 : i32
    %c0_i32_0 = arith.constant 0 : i32
    %c0_i32_1 = arith.constant 0 : i32
    return %c0_i32, %c0_i32_0 : i32, i32
  }
  func.func @transform_2(%arg0: i32, %arg1: i32) -> (i32, i32) {
    %c0_i32 = arith.constant 0 : i32
    %c0_i32_0 = arith.constant 0 : i32
    %c0_i32_1 = arith.constant 0 : i32
    return %c0_i32, %c0_i32_0 : i32, i32
  }
  func.func @transform_3(%arg0: i32, %arg1: i32) -> (i32, i32, i32) {
    %c0_i32 = arith.constant 0 : i32
    %c0_i32_0 = arith.constant 0 : i32
    return %arg0, %c0_i32, %arg1 : i32, i32, i32
  }
}

</mosaic_0001>

<bundles_post_ra>
// kernel: up_conv_forward.3
= control target key start
LH: loop header
LB: loop body
LE: loop exit
PB: predicated region body
PF: predicated region fallthrough
CT: control target
= control target key end

     0   :  { %s433_s12 = smov 0   ;;  %s435_s13 = smov 0   ;;  %s472_s0 = inlined_call_operand.vmem [shape: f32[2,8,1024], index: 0, kind: input, shape index: {}, may-alias: {0,3}]   ;;  %s473_s1 = inlined_call_operand.vmem [shape: f32[8,1], index: 1, kind: input, shape index: {}]   ;;  %s474_s2 = inlined_call_operand.vmem [shape: f32[8,1], index: 2, kind: input, shape index: {}]   ;;  %s475_s3 = inlined_call_operand.vmem [shape: f32[2,8,1024], index: 3, kind: output, shape index: {}, may-alias: {0,3}]  }
   0x1   :  { %s437_s14 = smov 0  }
   0x2 LB: > { %s25_s15 = sadd.s32 1, %s406_s13  ;;  %p353_p0 = scmp.ge.s32.totalorder %s410_s14, 1  ;;  %s410_s14 = sphi %s437_s14, %s13_s14   ;;  %s406_s13 = sphi %s435_s13, %s477_s13   ;;  %s402_s12 = sphi %s433_s12, %s476_s12  }
   0x3   : > { %p27_p1 = scmp.ge.s32.totalorder %s25_s15, 2  ;;  %p158_p2 = scmp.lt.s32.totalorder %s410_s14, 3 }
   0x5   : > { %s479_s15 = smov (%p27_p1, %s25_s15), 0  ;;  %p159_p3 = pnand %p353_p0, %p158_p2 }
   0x6   : > { %p191_p4 = scmp.lt.s32.totalorder (!%p159_p3), %s402_s12, 1 }
   0x7   : > { %162 = sbr.rel (%p159_p3) target bundleno = 149 (0x95), region = 32 }
   0xc   : > { %v218_v0 = vld [vmem:[%s473_s1] sm:$0xff]  ;;  %v412_v1 = vmov 0   ;;  %s481_s12 = smov (!%p191_p4, %s402_s12), 1 }
   0xd   : > { %387 = vset.pattern.permute.xlu0 %v412_v1  ;;  %v232_v2 = vld [vmem:[%s474_s2] sm:$0xff]  ;;  %s360_s20 = sshll.u32 %s481_s12, 6 }
   0xe   : > { %221 = vperm.xlu0 %387, %v218_v0   ;;  %s198_s23 = scalar_lea.vmem %s472_s0, %s360_s20  ;;  %s208_s26 = scalar_lea.vmem %s475_s3, %s360_s20 }
   0xf   : > { %v210_v4 = vld [vmem:[%s198_s23] sm:$0xff]  ;;  %v211_v5 = vld [vmem:[%s198_s23 + $0x8] sm:$0xff]  ;;  %v212_v6 = vld [vmem:[%s198_s23 + $0x10] sm:$0xff] }
  0x10   : > { %v213_v7 = vld [vmem:[%s198_s23 + $0x18] sm:$0xff]  ;;  %v214_v8 = vld [vmem:[%s198_s23 + $0x20] sm:$0xff]  ;;  %v215_v9 = vld [vmem:[%s198_s23 + $0x28] sm:$0xff] }
  0x11   : > { %v216_v10 = vld [vmem:[%s198_s23 + $0x30] sm:$0xff]  ;;  %v217_v11 = vld [vmem:[%s198_s23 + $0x38] sm:$0xff] }
  0x16   : > { %235 = vperm.xlu0 %387, %v232_v2  }
  0x80   : > { %v222_v3 = vpop.permute.xlu0 %221 }
  0x81   : > { %v224_v12 = vmul.f32 %v222_v3, %v210_v4  ;;  %v225_v13 = vmul.f32 %v222_v3, %v211_v5  ;;  %v226_v14 = vmul.f32 %v222_v3, %v212_v6  ;;  %v227_v15 = vmul.f32 %v222_v3, %v213_v7 }
  0x82   : > { %v228_v17 = vmul.f32 %v222_v3, %v214_v8  ;;  %v229_v18 = vmul.f32 %v222_v3, %v215_v9  ;;  %v230_v19 = vmul.f32 %v222_v3, %v216_v10  ;;  %v231_v24 = vmul.f32 %v222_v3, %v217_v11 }
  0x88   : > { %v236_v16 = vpop.permute.xlu0 %235 }
  0x89   : > { %v238_v20 = vadd.f32 %v236_v16, %v224_v12  ;;  %v239_v21 = vadd.f32 %v236_v16, %v225_v13  ;;  %v240_v22 = vadd.f32 %v236_v16, %v226_v14  ;;  %v241_v23 = vadd.f32 %v236_v16, %v227_v15 }
  0x8a   : > { %v242_v25 = vadd.f32 %v236_v16, %v228_v17  ;;  %v243_v26 = vadd.f32 %v236_v16, %v229_v18  ;;  %v244_v27 = vadd.f32 %v236_v16, %v230_v19  ;;  %v245_v31 = vadd.f32 %v236_v16, %v231_v24 }
  0x8b   : > { %v246_v28 = vmax.f32 %v238_v20, 0.0  ;;  %v247_v29 = vmax.f32 %v239_v21, 0.0  ;;  %v248_v30 = vmax.f32 %v240_v22, 0.0  ;;  %v249_v32 = vmax.f32 %v241_v23, 0.0 }
  0x8c   : > { %v250_v33 = vmax.f32 %v242_v25, 0.0  ;;  %v251_v34 = vmax.f32 %v243_v26, 0.0  ;;  %v252_v35 = vmax.f32 %v244_v27, 0.0  ;;  %v253_v36 = vmax.f32 %v245_v31, 0.0 }
  0x8d   : > { %254 = vst [vmem:[%s208_s26] sm:$0xff] %v246_v28 }
  0x8e   : > { %255 = vst [vmem:[%s208_s26 + $0x8] sm:$0xff] %v247_v29 }
  0x8f   : > { %256 = vst [vmem:[%s208_s26 + $0x10] sm:$0xff] %v248_v30 }
  0x90   : > { %257 = vst [vmem:[%s208_s26 + $0x18] sm:$0xff] %v249_v32 }
  0x91   : > { %258 = vst [vmem:[%s208_s26 + $0x20] sm:$0xff] %v250_v33 }
  0x92   : > { %259 = vst [vmem:[%s208_s26 + $0x28] sm:$0xff] %v251_v34 }
  0x93   : > { %260 = vst [vmem:[%s208_s26 + $0x30] sm:$0xff] %v252_v35 }
  0x94   : > { %261 = vst [vmem:[%s208_s26 + $0x38] sm:$0xff] %v253_v36 }
  0x95 PF: > { %s13_s14 = sadd.s32 1, %s410_s14   ;;  %s476_s12 = smov %s406_s13 }
  0x96   : > { %p10_p5 = scmp.ge.s32.totalorder %s13_s14, 4   ;;  %s477_s13 = smov %s479_s15 }
  0x98   :  { %12 = sbr.rel (!%p10_p5) target bundleno = 2 (0x2), region = 62 }

// kernel: up_conv_forward.2
= control target key start
LH: loop header
LB: loop body
LE: loop exit
PB: predicated region body
PF: predicated region fallthrough
CT: control target
= control target key end

     0   :  { %s2326_s18 = smov 0   ;;  %s3986_s0 = inlined_call_operand.vmem [shape: f32[2,18,18,8], index: 0, kind: input, shape index: {}]   ;;  %s3987_s1 = inlined_call_operand.vmem [shape: f32[4,4,8,8], index: 1, kind: input, shape index: {}]   ;;  %s3988_s2 = inlined_call_operand.vmem [shape: f32[8,1], index: 2, kind: input, shape index: {}]   ;;  %s3989_s3 = inlined_call_operand.vmem [shape: f32[2,2,2,8,256], index: 3, kind: output, shape index: {0}]   ;;  %s3990_s4 = inlined_call_operand.vmem [shape: f32[2,8,1], index: 4, kind: output, shape index: {1}]   ;;  %s3991_s5 = inlined_call_operand.vmem [shape: f32[2,8,1], index: 5, kind: output, shape index: {2}]  }
   0x1 LB: > { %s1673_s19 = sadd.s32 4294967295, %s2293_s18   ;;  %p1677_p0 = scmp.ge.s32.totalorder %s2293_s18, 1  ;;  %s2293_s18 = sphi %s2326_s18, %s16_s18  }
   0x2   : > { %p192_p1 = scmp.lt.s32.totalorder %s2293_s18, 3 }
   0x4   : > { %p193_p2 = pnand %p1677_p0, %p192_p1 }
   0x6   : > { %196 = sbr.rel (%p193_p2) target bundleno = 787 (0x313), region = 32 }
   0xb   : > { %p228_p3 = scmp.lt.s32.totalorder %s1673_s19, 1  ;;  %vm433_vm0 = vcmask 64512   ;;  %vm350_vm1 = vcmask 1046528   ;;  %vm779_vm2 = vcmask 1045504   ;;  %vm1553_vm3 = vcmask 7168  }
   0xd   : > { %s4322_s19 = smov (!%p228_p3, %s1673_s19), 1 }
   0xe   : > { %s2251_s20 = smul.u32 432, %s4322_s19  ;;  %s2250_s10 = sshll.u32 %s4322_s19, 6 }
   0xf   : > { %s237_s13 = scalar_lea.vmem %s3989_s3, %s2250_s10  ;;  %s1681_s14 = sshll.u32 %s4322_s19, 3 }
  0x10   : > { %s2340_s23 = scalar_lea.vmem %s3986_s0, %s2251_s20  ;;  %s241_s17 = scalar_lea.vmem %s3990_s4, %s1681_s14 }
  0x11   : > { %v2343_v0 = vld [vmem:[%s2340_s23 + $0xb0] sm:$0xff]  ;;  %v2349_v2 = vld [vmem:[%s2340_s23 + $0xb8] sm:$0x3]  ;;  %v2362_v7 = vld [vmem:[%s2340_s23 + $0xa8] sm:$0xff]  ;;  %s245_s22 = scalar_lea.vmem %s3991_s5, %s1681_s14 }
  0x12   : > { %v2346_v1 = vld [vmem:[%s2340_s23 + $0x170] sm:$0xff]  ;;  %4130 = vst [vmem:[#allocation2_spill] sm:$0xff] %v2349_v2  ;;  %v387_v3 = vrot.slane %v2343_v0, 1  ;;  %1718 = vmatpush.xpose.msk.msra.mxu2 %vm433_vm0, %v2343_v0  ;;  %v389_v5 = vrot.slane %v2349_v2, 1  ;;  %v2359_v6 = vld [vmem:[%s2340_s23 + $0x178] sm:$0x3] }
  0x13   : > { %v427_v4 = vrot.slane %v2346_v1, 1  ;;  %1735 = vmatpush.xpose.msk.msra.mxu3 %vm433_vm0, %v2346_v1  ;;  %4131 = vst [vmem:[#allocation3_spill] sm:$0xff] %v2359_v6  ;;  %v429_v8 = vrot.slane %v2359_v6, 1  ;;  %v386_v9 = vrot.slane %v2362_v7, 1  ;;  %v2367_v10 = vld [vmem:[%s2340_s23 + $0x168] sm:$0xff]  ;;  %v2370_v11 = vld [vmem:[%s2340_s23 + $0x98] sm:$0xff] }
  0x14   : > { %v2373_v12 = vsel %vm350_vm1, %v387_v3, %v389_v5  ;;  %v426_v13 = vrot.slane %v2367_v10, 1  ;;  %v2377_v14 = vld [vmem:[%s2340_s23 + $0x158] sm:$0xff]  ;;  %v2380_v15 = vld [vmem:[%s2340_s23 + $0xa0] sm:$0x3]  ;;  %v382_v19 = vrot.slane %v2370_v11, 1  ;;  %v2407_v24 = vld [vmem:[%s2340_s23 + $0x90] sm:$0xff] }
  0x15   : > { %4132 = vst [vmem:[#allocation4_spill] sm:$0xff] %v2373_v12  ;;  %1684 = vmatpush.xpose.msk.msra.mxu0 %vm433_vm0, %v2373_v12  ;;  %v2385_v16 = vsel %vm350_vm1, %v427_v4, %v429_v8  ;;  %v2388_v17 = vld [vmem:[%s2340_s23 + $0x160] sm:$0x3]  ;;  %v2395_v18 = vsel %vm350_vm1, %v386_v9, %v387_v3  ;;  %v384_v20 = vrot.slane %v2380_v15, 1  ;;  %v422_v22 = vrot.slane %v2377_v14, 1  ;;  %v2410_v25 = vld [vmem:[%s2340_s23 + $0x150] sm:$0xff] }
  0x16   : > { %4133 = vst [vmem:[#allocation5_spill] sm:$0xff] %v2380_v15  ;;  %1701 = vmatpush.xpose.msk.msra.mxu1 %vm433_vm0, %v2385_v16  ;;  %1719 = vmatpush.xpose.msk.msra.mxu2 %vm433_vm0, %v2362_v7  ;;  %v2402_v21 = vsel %vm350_vm1, %v426_v13, %v427_v4  ;;  %v424_v23 = vrot.slane %v2388_v17, 1  ;;  %v381_v27 = vrot.slane %v2407_v24, 1  ;;  %v421_v29 = vrot.slane %v2410_v25, 1  ;;  %v2429_v30 = vld [vmem:[%s2340_s23 + $0x80] sm:$0xff]  ;;  %v2459_v40 = vld [vmem:[%s2340_s23 + $0x78] sm:$0xff] }
  0x17   : > { %4134 = vst [vmem:[#allocation6_spill] sm:$0xff] %v2385_v16  ;;  %1736 = vmatpush.xpose.msk.msra.mxu3 %vm433_vm0, %v2367_v10  ;;  %v2419_v26 = vsel %vm350_vm1, %v382_v19, %v384_v20  ;;  %v2432_v31 = vld [vmem:[%s2340_s23 + $0x88] sm:$0x3]  ;;  %v2435_v32 = vld [vmem:[%s2340_s23 + $0x140] sm:$0xff]  ;;  %v377_v35 = vrot.slane %v2429_v30, 1  ;;  %v2462_v41 = vld [vmem:[%s2340_s23 + $0x138] sm:$0xff] }
  0x18   : > { %4135 = vst [vmem:[#allocation7_spill] sm:$0xff] %v2388_v17  ;;  %v2425_v28 = vsel %vm350_vm1, %v422_v22, %v424_v23  ;;  %v2438_v33 = vld [vmem:[%s2340_s23 + $0x148] sm:$0x3]  ;;  %v2447_v34 = vsel %vm350_vm1, %v381_v27, %v382_v19  ;;  %v379_v36 = vrot.slane %v2432_v31, 1  ;;  %v2454_v37 = vsel %vm350_vm1, %v421_v29, %v422_v22  ;;  %v2484_v47 = vld [vmem:[%s2340_s23 + $0x70] sm:$0x3] }
  0x19   : > { %4136 = vst [vmem:[#allocation8_spill] sm:$0xff] %v2407_v24  ;;  %1685 = vmatpush.xpose.msk.msra.mxu0 %vm433_vm0, %v2395_v18  ;;  %v417_v38 = vrot.slane %v2435_v32, 1  ;;  %v419_v39 = vrot.slane %v2438_v33, 1  ;;  %v376_v43 = vrot.slane %v2459_v40, 1  ;;  %v416_v45 = vrot.slane %v2462_v41, 1  ;;  %v2481_v46 = vld [vmem:[%s2340_s23 + $0x68] sm:$0xff] }
  0x1a   : > { %4137 = vst [vmem:[#allocation9_spill] sm:$0xff] %v2410_v25  ;;  %1702 = vmatpush.xpose.msk.msra.mxu1 %vm433_vm0, %v2402_v21  ;;  %1720 = vmatpush.xpose.msk.msra.mxu2 %vm433_vm0, %v2370_v11  ;;  %v2471_v42 = vsel %vm350_vm1, %v377_v35, %v379_v36  ;;  %v2487_v48 = vld [vmem:[%s2340_s23 + $0x128] sm:$0xff]  ;;  %v2490_v49 = vld [vmem:[%s2340_s23 + $0x130] sm:$0x3]  ;;  %v372_v51 = vrot.slane %v2481_v46, 1  ;;  %v374_v52 = vrot.slane %v2484_v47, 1 }
  0x1b   : > { %1737 = vmatpush.xpose.msk.msra.mxu3 %vm433_vm0, %v2377_v14  ;;  %4138 = vst [vmem:[#allocation10_spill] sm:$0xff] %v2429_v30  ;;  %v2477_v44 = vsel %vm350_vm1, %v417_v38, %v419_v39  ;;  %v2499_v50 = vsel %vm350_vm1, %v376_v43, %v377_v35  ;;  %v2506_v53 = vsel %vm350_vm1, %v416_v45, %v417_v38  ;;  %v412_v54 = vrot.slane %v2487_v48, 1  ;;  %v2511_v56 = vld [vmem:[%s2340_s23 + $0x60] sm:$0xff]  ;;  %v2533_v62 = vld [vmem:[%s2340_s23 + $0x50] sm:$0xff]  ;;  %v2536_v63 = vld [vmem:[%s2340_s23 + $0x58] sm:$0x3] }
  0x1c   : > { %4139 = vst [vmem:[#allocation11_spill] sm:$0xff] %v2432_v31  ;;  %v414_v55 = vrot.slane %v2490_v49, 1  ;;  %v2514_v57 = vld [vmem:[%s2340_s23 + $0x120] sm:$0xff]  ;;  %v2523_v58 = vsel %vm350_vm1, %v372_v51, %v374_v52  ;;  %v371_v59 = vrot.slane %v2511_v56, 1  ;;  %v2539_v3 = vld [vmem:[%s2340_s23 + $0x110] sm:$0xff]  ;;  %v367_v8 = vrot.slane %v2533_v62, 1 }
  0x1d   : > { %4140 = vst [vmem:[#allocation12_spill] sm:$0xff] %v2435_v32  ;;  %1686 = vmatpush.xpose.msk.msra.mxu0 %vm433_vm0, %v2419_v26  ;;  %v411_v61 = vrot.slane %v2514_v57, 1  ;;  %v2542_v4 = vld [vmem:[%s2340_s23 + $0x118] sm:$0x3]  ;;  %v369_v9 = vrot.slane %v2536_v63, 1  ;;  %v407_v19 = vrot.slane %v2539_v3, 1 }
  0x1e   : > { %4141 = vst [vmem:[#allocation13_spill] sm:$0xff] %v2438_v33  ;;  %1703 = vmatpush.xpose.msk.msra.mxu1 %vm433_vm0, %v2425_v28  ;;  %1721 = vmatpush.xpose.msk.msra.mxu2 %vm433_vm0, %v2407_v24  ;;  %v2529_v60 = vsel %vm350_vm1, %v412_v54, %v414_v55  ;;  %v2551_v5 = vsel %vm350_vm1, %v371_v59, %v372_v51  ;;  %v409_v20 = vrot.slane %v2542_v4, 1  ;;  %v2563_v22 = vld [vmem:[%s2340_s23 + $0x48] sm:$0xff]  ;;  %v2585_v38 = vld [vmem:[%s2340_s23 + $0x38] sm:$0xff]  ;;  %v2588_v39 = vld [vmem:[%s2340_s23 + $0x40] sm:$0x3] }
  0x1f   : > { %1738 = vmatpush.xpose.msk.msra.mxu3 %vm433_vm0, %v2410_v25  ;;  %4142 = vst [vmem:[#allocation14_spill] sm:$0xff] %v2459_v40  ;;  %v2558_v13 = vsel %vm350_vm1, %v411_v61, %v412_v54  ;;  %v2566_v23 = vld [vmem:[%s2340_s23 + $0x108] sm:$0xff]  ;;  %v2575_v27 = vsel %vm350_vm1, %v367_v8, %v369_v9  ;;  %v366_v29 = vrot.slane %v2563_v22, 1  ;;  %v2591_v43 = vld [vmem:[%s2340_s23 + $0xf8] sm:$0xff]  ;;  %v2594_v45 = vld [vmem:[%s2340_s23 + $0x100] sm:$0x3] }
  0x20   : > { %4143 = vst [vmem:[#allocation15_spill] sm:$0xff] %v2462_v41  ;;  %v2581_v35 = vsel %vm350_vm1, %v407_v19, %v409_v20  ;;  %v406_v36 = vrot.slane %v2566_v23, 1  ;;  %v362_v52 = vrot.slane %v2585_v38, 1  ;;  %v364_v54 = vrot.slane %v2588_v39, 1  ;;  %v2618_v9 = vld [vmem:[%s2340_s23 + $0xf0] sm:$0xff]  ;;  %v2689_v17 = vld [vmem:[%s2340_s23 + $0x8] sm:$0xff] }
  0x21   : > { %1687 = vmatpush.xpose.msk.msra.mxu0 %vm433_vm0, %v2447_v34  ;;  %4144 = vst [vmem:[#allocation16_spill] sm:$0xff] %v2481_v46  ;;  %v2603_v51 = vsel %vm350_vm1, %v366_v29, %v367_v8  ;;  %v402_v59 = vrot.slane %v2591_v43, 1  ;;  %v404_v61 = vrot.slane %v2594_v45, 1  ;;  %v2615_v8 = vld [vmem:[%s2340_s23 + $0x30] sm:$0xff]  ;;  %v2712_v2 = vld [vmem:[%s2340_s23 + $0x188] sm:$0xff] }
  0x22   : > { %1704 = vmatpush.xpose.msk.msra.mxu1 %vm433_vm0, %v2454_v37  ;;  %1722 = vmatpush.xpose.msk.msra.mxu2 %vm433_vm0, %v2429_v30  ;;  %4145 = vst [vmem:[#allocation17_spill] sm:$0xff] %v2484_v47  ;;  %v2610_v55 = vsel %vm350_vm1, %v406_v36, %v407_v19  ;;  %v2627_v19 = vsel %vm350_vm1, %v362_v52, %v364_v54  ;;  %v361_v20 = vrot.slane %v2615_v8, 1  ;;  %v401_v36 = vrot.slane %v2618_v9, 1  ;;  %v2646_v54 = vld [vmem:[%s2340_s23 + $0xe8] sm:$0x3] }
  0x23   : > { %1739 = vmatpush.xpose.msk.msra.mxu3 %vm433_vm0, %v2435_v32  ;;  %4146 = vst [vmem:[#allocation18_spill] sm:$0xff] %v2487_v48  ;;  %v2633_v29 = vsel %vm350_vm1, %v402_v59, %v404_v61  ;;  %v399_v31 = vrot.slane %v2646_v54, 1  ;;  %v2692_v15 = vld [vmem:[%s2340_s23 + $0x10] sm:$0x3] }
  0x24   : > { %4147 = vst [vmem:[#allocation19_spill] sm:$0xff] %v2490_v49  ;;  %v2655_v61 = vsel %vm350_vm1, %v361_v20, %v362_v52  ;;  %v2662_v47 = vsel %vm350_vm1, %v401_v36, %v402_v59  ;;  %v2667_v52 = vld [vmem:[%s2340_s23 + $0x18] sm:$0xff]  ;;  %v354_v6 = vrot.slane %v2692_v15, 1 }
  0x25   : > { %1688 = vmatpush.xpose.msk.msra.mxu0 %vm433_vm0, %v2471_v42  ;;  %4148 = vst [vmem:[#allocation20_spill] sm:$0xff] %v2511_v56  ;;  %v2670_v20 = vld [vmem:[%s2340_s23 + $0xd8] sm:$0xff]  ;;  %v356_v36 = vrot.slane %v2667_v52, 1 }
  0x26   : > { %1705 = vmatpush.xpose.msk.msra.mxu1 %vm433_vm0, %v2477_v44  ;;  %1723 = vmatpush.xpose.msk.msra.mxu2 %vm433_vm0, %v2459_v40  ;;  %4149 = vst [vmem:[#allocation21_spill] sm:$0xff] %v2514_v57 }
  0x27   : > { %1740 = vmatpush.xpose.msk.msra.mxu3 %vm433_vm0, %v2462_v41  ;;  %4150 = vst [vmem:[#allocation22_spill] sm:$0xff] %v2533_v62 }
  0x28   : > { %4151 = vst [vmem:[#allocation23_spill] sm:$0xff] %v2536_v63 }
  0x29   : > { %1689 = vmatpush.xpose.msk.msra.mxu0 %vm433_vm0, %v2499_v50  ;;  %4152 = vst [vmem:[#allocation24_spill] sm:$0xff] %v2539_v3 }
  0x2a   : > { %1706 = vmatpush.xpose.msk.msra.mxu1 %vm433_vm0, %v2506_v53  ;;  %1724 = vmatpush.xpose.msk.msra.mxu2 %vm433_vm0, %v2481_v46  ;;  %4153 = vst [vmem:[#allocation25_spill] sm:$0xff] %v2542_v4  ;;  %v2643_v4 = vld [vmem:[%s2340_s23 + $0xe0] sm:$0xff] }
  0x2b   : > { %1741 = vmatpush.xpose.msk.msra.mxu3 %vm433_vm0, %v2487_v48  ;;  %4154 = vst [vmem:[#allocation26_spill] sm:$0xff] %v2563_v22  ;;  %v397_v33 = vrot.slane %v2643_v4, 1 }
  0x2c   : > { %4155 = vst [vmem:[#allocation27_spill] sm:$0xff] %v2566_v23 }
  0x2d   : > { %1690 = vmatpush.xpose.msk.msra.mxu0 %vm433_vm0, %v2523_v58  ;;  %4156 = vst [vmem:[#allocation28_spill] sm:$0xff] %v2585_v38 }
  0x2e   : > { %1707 = vmatpush.xpose.msk.msra.mxu1 %vm433_vm0, %v2529_v60  ;;  %1725 = vmatpush.xpose.msk.msra.mxu2 %vm433_vm0, %v2511_v56  ;;  %4157 = vst [vmem:[#allocation29_spill] sm:$0xff] %v2588_v39  ;;  %v2640_v39 = vld [vmem:[%s2340_s23 + $0x28] sm:$0x3] }
  0x2f   : > { %1742 = vmatpush.xpose.msk.msra.mxu3 %vm433_vm0, %v2514_v57  ;;  %4158 = vst [vmem:[#allocation30_spill] sm:$0xff] %v2591_v43  ;;  %v359_v49 = vrot.slane %v2640_v39, 1 }
  0x30   : > { %4159 = vst [vmem:[#allocation31_spill] sm:$0xff] %v2594_v45  ;;  %v2637_v45 = vld [vmem:[%s2340_s23 + $0x20] sm:$0xff] }
  0x31   : > { %1691 = vmatpush.xpose.msk.msra.mxu0 %vm433_vm0, %v2551_v5  ;;  %4160 = vst [vmem:[#allocation32_spill] sm:$0xff] %v2610_v55  ;;  %v357_v63 = vrot.slane %v2637_v45, 1 }
  0x32   : > { %1708 = vmatpush.xpose.msk.msra.mxu1 %vm433_vm0, %v2558_v13  ;;  %1726 = vmatpush.xpose.msk.msra.mxu2 %vm433_vm0, %v2533_v62  ;;  %4161 = vst [vmem:[#allocation33_spill] sm:$0xff] %v2615_v8 }
  0x33   : > { %1743 = vmatpush.xpose.msk.msra.mxu3 %vm433_vm0, %v2539_v3  ;;  %4162 = vst [vmem:[#allocation34_spill] sm:$0xff] %v2618_v9  ;;  %v2679_v59 = vsel %vm350_vm1, %v357_v63, %v359_v49  ;;  %v2698_v49 = vld [vmem:[%s2340_s23 + $0xd0] sm:$0x3] }
  0x34   : > { %4163 = vst [vmem:[#allocation35_spill] sm:$0xff] %v2627_v19 }
  0x35   : > { %1692 = vmatpush.xpose.msk.msra.mxu0 %vm433_vm0, %v2575_v27  ;;  %4164 = vst [vmem:[#allocation36_spill] sm:$0xff] %v2633_v29 }
  0x36   : > { %1709 = vmatpush.xpose.msk.msra.mxu1 %vm433_vm0, %v2581_v35  ;;  %1727 = vmatpush.xpose.msk.msra.mxu2 %vm433_vm0, %v2563_v22  ;;  %4165 = vst [vmem:[#allocation37_spill] sm:$0xff] %v2637_v45 }
  0x37   : > { %1744 = vmatpush.xpose.msk.msra.mxu3 %vm433_vm0, %v2566_v23  ;;  %4166 = vst [vmem:[#allocation38_spill] sm:$0xff] %v2640_v39  ;;  %v396_v39 = vrot.slane %v2670_v20, 1 }
  0x38   : > { %4167 = vst [vmem:[#allocation39_spill] sm:$0xff] %v2643_v4 }
  0x39   : > { %1693 = vmatpush.xpose.msk.msra.mxu0 %vm433_vm0, %v2603_v51  ;;  %4168 = vst [vmem:[#allocation40_spill] sm:$0xff] %v2646_v54  ;;  %v2685_v54 = vsel %vm350_vm1, %v397_v33, %v399_v31  ;;  %v2707_v31 = vsel %vm350_vm1, %v356_v36, %v357_v63  ;;  %v394_v63 = vrot.slane %v2698_v49, 1  ;;  %v2725_v36 = vld [vmem:[%s2340_s23] sm:$0xff] }
  0x3a   : > { %1710 = vmatpush.xpose.msk.msra.mxu1 %vm433_vm0, %v2610_v55  ;;  %1728 = vmatpush.xpose.msk.msra.mxu2 %vm433_vm0, %v2585_v38  ;;  %4169 = vst [vmem:[#allocation41_spill] sm:$0xff] %v2655_v61 }
  0x3b   : > { %1745 = vmatpush.xpose.msk.msra.mxu3 %vm433_vm0, %v2591_v43  ;;  %4170 = vst [vmem:[#allocation42_spill] sm:$0xff] %v2662_v47 }
  0x3c   : > { %4171 = vst [vmem:[#allocation43_spill] sm:$0xff] %v2667_v52 }
  0x3d   : > { %1694 = vmatpush.xpose.msk.msra.mxu0 %vm433_vm0, %v2627_v19  ;;  %4172 = vst [vmem:[#allocation44_spill] sm:$0xff] %v2670_v20 }
  0x3e   : > { %1711 = vmatpush.xpose.msk.msra.mxu1 %vm433_vm0, %v2633_v29  ;;  %1729 = vmatpush.xpose.msk.msra.mxu2 %vm433_vm0, %v2615_v8  ;;  %4173 = vst [vmem:[#allocation45_spill] sm:$0xff] %v2679_v59 }
  0x3f   : > { %1746 = vmatpush.xpose.msk.msra.mxu3 %vm433_vm0, %v2618_v9  ;;  %4174 = vst [vmem:[#allocation46_spill] sm:$0xff] %v2685_v54  ;;  %v2715_v9 = vld [vmem:[%s2340_s23 + $0x190] sm:$0x3] }
  0x40   : > { %4175 = vst [vmem:[#allocation47_spill] sm:$0xff] %v2689_v17  ;;  %v705_v8 = vrot.slane %v2715_v9, 1 }
  0x41   : > { %1695 = vmatpush.xpose.msk.msra.mxu0 %vm433_vm0, %v2655_v61  ;;  %4176 = vst [vmem:[#allocation48_spill] sm:$0xff] %v2692_v15  ;;  %v703_v15 = vrot.slane %v2712_v2, 1 }
  0x42   : > { %1712 = vmatpush.xpose.msk.msra.mxu1 %vm433_vm0, %v2662_v47  ;;  %1730 = vmatpush.xpose.msk.msra.mxu2 %vm433_vm0, %v2637_v45  ;;  %v2695_v45 = vld [vmem:[%s2340_s23 + $0xc8] sm:$0xff]  ;;  %4178 = vst [vmem:[#allocation50_spill] sm:$0xff] %v2698_v49  ;;  %v2743_v49 = vld [vmem:[%s2340_s23 + $0x180] sm:$0xff] }
  0x43   : > { %1747 = vmatpush.xpose.msk.msra.mxu3 %vm433_vm0, %v2643_v4  ;;  %4177 = vst [vmem:[#allocation49_spill] sm:$0xff] %v2695_v45  ;;  %v352_v4 = vrot.slane %v2689_v17, 1 }
  0x44   : > { %4179 = vst [vmem:[#allocation51_spill] sm:$0xff] %v2707_v31 }
  0x45   : > { %1696 = vmatpush.xpose.msk.msra.mxu0 %vm433_vm0, %v2679_v59  ;;  %4180 = vst [vmem:[#allocation52_spill] sm:$0xff] %v2712_v2  ;;  %v2728_v59 = vld [vmem:[%s2340_s23 + $0xc0] sm:$0xff] }
  0x46   : > { %1713 = vmatpush.xpose.msk.msra.mxu1 %vm433_vm0, %v2685_v54  ;;  %1731 = vmatpush.xpose.msk.msra.mxu2 %vm433_vm0, %v2667_v52  ;;  %4181 = vst [vmem:[#allocation53_spill] sm:$0xff] %v2715_v9  ;;  %v2720_v54 = vsel %vm350_vm1, %v396_v39, %v397_v33  ;;  %v392_v52 = vrot.slane %v2695_v45, 1  ;;  %v2739_v33 = vsel %vm350_vm1, %v352_v4, %v354_v6  ;;  %v351_v39 = vrot.slane %v2725_v36, 1 }
  0x47   : > { %1748 = vmatpush.xpose.msk.msra.mxu3 %vm433_vm0, %v2670_v20  ;;  %4182 = vst [vmem:[#allocation54_spill] sm:$0xff] %v2720_v54  ;;  %v391_v9 = vrot.slane %v2728_v59, 1  ;;  %v702_v6 = vrot.slane %v2743_v49, 1 }
  0x48   : > { %4183 = vst [vmem:[#allocation55_spill] sm:$0xff] %v2728_v59  ;;  %v2748_v20 = vsel %vm350_vm1, %v392_v52, %v394_v63 }
  0x49   : > { %1697 = vmatpush.xpose.msk.msra.mxu0 %vm433_vm0, %v2707_v31  ;;  %4184 = vst [vmem:[#allocation56_spill] sm:$0xff] %v2739_v33  ;;  %v2776_v63 = vsel %vm350_vm1, %v702_v6, %v703_v15  ;;  %v4194_v6 = vld [vmem:[#allocation46_spill] sm:$0xff] }
  0x4a   : > { %1714 = vmatpush.xpose.msk.msra.mxu1 %vm433_vm0, %v2720_v54  ;;  %1732 = vmatpush.xpose.msk.msra.mxu2 %vm433_vm0, %v2689_v17  ;;  %4185 = vst [vmem:[#allocation57_spill] sm:$0xff] %v2743_v49  ;;  %v2754_v17 = vsel %vm350_vm1, %v703_v15, %v705_v8  ;;  %v2762_v54 = vsel %vm350_vm1, %v351_v39, %v352_v4  ;;  %v301_v15 = vld [vmem:[%s3987_s1] sm:$0xff]  ;;  %v1683_v4 = vld [vmem:[%s3987_s1 + $0x8] sm:$0xff]  ;;  %v4193_v39 = vld [vmem:[#allocation45_spill] sm:$0xff] }
  0x4b   : > { %1749 = vmatpush.xpose.msk.msra.mxu3 %vm433_vm0, %v2695_v45  ;;  %4186 = vst [vmem:[#allocation58_spill] sm:$0xff] %v2748_v20  ;;  %v2769_v8 = vsel %vm350_vm1, %v391_v9, %v392_v52  ;;  %v4191_v9 = vld [vmem:[#allocation33_spill] sm:$0xff]  ;;  %v4192_v52 = vld [vmem:[#allocation34_spill] sm:$0xff] }
  0x4c   : > { %4187 = vst [vmem:[#allocation59_spill] sm:$0xff] %v2754_v17 }
  0x4d   : > { %1698 = vmatpush.xpose.msk.msra.mxu0 %vm433_vm0, %v2739_v33  ;;  %4188 = vst [vmem:[#allocation60_spill] sm:$0xff] %v2762_v54 }
  0x4e   : > { %1715 = vmatpush.xpose.msk.msra.mxu1 %vm433_vm0, %v2748_v20  ;;  %1733 = vmatpush.xpose.msk.msra.mxu2 %vm433_vm0, %v2725_v36  ;;  %4189 = vst [vmem:[#allocation61_spill] sm:$0xff] %v2769_v8 }
  0x4f   : > { %1750 = vmatpush.xpose.msk.msra.mxu3 %vm433_vm0, %v2728_v59  ;;  %4190 = vst [vmem:[#allocation62_spill] sm:$0xff] %v2776_v63 }
  0x51   : > { %1699 = vmatpush.xpose.msk.msra.mxu0 %vm433_vm0, %v2762_v54  ;;  %1734 = vmatmul.msk.f32.vlgmr.msra.gmra.mxu2 %vm433_vm0, %v301_v15 }
  0x52   : > { %1788 = vmatpush.xpose.msk.msrb.mxu2 %vm433_vm0, %v2748_v20  ;;  %1716 = vmatpush.xpose.msk.msra.mxu1 %vm433_vm0, %v2769_v8  ;;  %v4199_v20 = vld [vmem:[#allocation54_spill] sm:$0xff] }
  0x53   : > { %1805 = vmatpush.xpose.msk.msrb.mxu3 %vm433_vm0, %v2754_v17  ;;  %v856_v17 = vrot.slane %v2346_v1, 2 }
  0x54   : > { %1751 = vmatmul.msk.f32.vlgmr.msra.gmra.mxu3 %vm433_vm0, %v301_v15  ;;  %1700 = vmatmul.msk.f32.vlgmr.msra.gmra.mxu0 %vm433_vm0, %v1683_v4  ;;  %v816_v15 = vrot.slane %v2343_v0, 2 }
  0x55   : > { %1753 = vmatpush.xpose.msk.msrb.mxu0 %vm433_vm0, %v2695_v45  ;;  %1717 = vmatmul.msk.f32.vlgmr.msra.gmra.mxu1 %vm433_vm0, %v1683_v4  ;;  %v4195_v4 = vld [vmem:[#allocation2_spill] sm:$0xff]  ;;  %v4203_v45 = vld [vmem:[#allocation44_spill] sm:$0xff] }
  0x56   : > { %1770 = vmatpush.xpose.msk.msrb.mxu1 %vm433_vm0, %v2712_v2  ;;  %1789 = vmatpush.xpose.msk.msrb.mxu2 %vm433_vm0, %v2769_v8  ;;  %v4196_v8 = vld [vmem:[#allocation3_spill] sm:$0xff] }
  0x57   : > { %1806 = vmatpush.xpose.msk.msrb.mxu3 %vm433_vm0, %v2776_v63  ;;  %v818_v63 = vrot.slane %v4195_v4, 2  ;;  %v858_v54 = vrot.slane %v4196_v8, 2  ;;  %v855_v8 = vrot.slane %v2367_v10, 2  ;;  %v4202_v2 = vld [vmem:[#allocation43_spill] sm:$0xff] }
  0x59   : > { %1754 = vmatpush.xpose.msk.msrb.mxu0 %vm433_vm0, %v2728_v59  ;;  %v4198_v59 = vld [vmem:[#allocation39_spill] sm:$0xff]  ;;  %v2924_v4 = vsel %vm779_vm2, %v816_v15, %v818_v63  ;;  %v2927_v33 = vsel %vm779_vm2, %v856_v17, %v858_v54  ;;  %v2946_v54 = vsel %vm779_vm2, %v855_v8, %v856_v17  ;;  %v811_v63 = vrot.slane %v2370_v11, 2 }
  0x5a   : > { %1771 = vmatpush.xpose.msk.msrb.mxu1 %vm433_vm0, %v2743_v49  ;;  %1790 = vmatpush.xpose.msk.msrb.mxu2 %vm433_vm0, %v2373_v12  ;;  %v4197_v49 = vld [vmem:[#allocation37_spill] sm:$0xff]  ;;  %4200 = vst [vmem:[#allocation2_spill] sm:$0xff] %v2924_v4  ;;  %v810_v17 = vrot.slane %v2407_v24, 2 }
  0x5b   : > { %1807 = vmatpush.xpose.msk.msrb.mxu3 %vm433_vm0, %v2385_v16  ;;  %4201 = vst [vmem:[#allocation3_spill] sm:$0xff] %v2927_v33 }
  0x5d   : > { %1755 = vmatpush.xpose.msk.msrb.mxu0 %vm433_vm0, %v2343_v0  ;;  %v1787_v0 = vld [vmem:[%s3987_s1 + $0x18] sm:$0xff] }
  0x5e   : > { %1772 = vmatpush.xpose.msk.msrb.mxu1 %vm433_vm0, %v2346_v1  ;;  %1791 = vmatpush.xpose.msk.msrb.mxu2 %vm433_vm0, %v2395_v18  ;;  %v815_v1 = vrot.slane %v2362_v7, 2 }
  0x5f   : > { %1808 = vmatpush.xpose.msk.msrb.mxu3 %vm433_vm0, %v2402_v21 }
  0x61   : > { %1756 = vmatpush.xpose.msk.msrb.mxu0 %vm433_vm0, %v2362_v7  ;;  %v1752_v7 = vld [vmem:[%s3987_s1 + $0x10] sm:$0xff] }
  0x62   : > { %1773 = vmatpush.xpose.msk.msrb.mxu1 %vm433_vm0, %v2367_v10  ;;  %1792 = vmatpush.xpose.msk.msrb.mxu2 %vm433_vm0, %v2419_v26  ;;  %v2943_v10 = vsel %vm779_vm2, %v815_v1, %v816_v15  ;;  %v2979_v1 = vsel %vm779_vm2, %v810_v17, %v811_v63 }
  0x63   : > { %1809 = vmatpush.xpose.msk.msrb.mxu3 %vm433_vm0, %v2425_v28 }
  0x65   : > { %1757 = vmatpush.xpose.msk.msrb.mxu0 %vm433_vm0, %v2370_v11  ;;  %v850_v11 = vrot.slane %v2410_v25, 2 }
  0x66   : > { %1774 = vmatpush.xpose.msk.msrb.mxu1 %vm433_vm0, %v2377_v14  ;;  %1793 = vmatpush.xpose.msk.msrb.mxu2 %vm433_vm0, %v2447_v34 }
  0x67   : > { %1810 = vmatpush.xpose.msk.msrb.mxu3 %vm433_vm0, %v2454_v37 }
  0x69   : > { %1758 = vmatpush.xpose.msk.msrb.mxu0 %vm433_vm0, %v2407_v24 }
  0x6a   : > { %1775 = vmatpush.xpose.msk.msrb.mxu1 %vm433_vm0, %v2410_v25  ;;  %1794 = vmatpush.xpose.msk.msrb.mxu2 %vm433_vm0, %v2471_v42 }
  0x6b   : > { %1811 = vmatpush.xpose.msk.msrb.mxu3 %vm433_vm0, %v2477_v44 }
  0x6d   : > { %1759 = vmatpush.xpose.msk.msrb.mxu0 %vm433_vm0, %v2429_v30 }
  0x6e   : > { %1776 = vmatpush.xpose.msk.msrb.mxu1 %vm433_vm0, %v2435_v32  ;;  %1795 = vmatpush.xpose.msk.msrb.mxu2 %vm433_vm0, %v2499_v50 }
  0x6f   : > { %1812 = vmatpush.xpose.msk.msrb.mxu3 %vm433_vm0, %v2506_v53 }
  0x71   : > { %1760 = vmatpush.xpose.msk.msrb.mxu0 %vm433_vm0, %v2459_v40 }
  0x72   : > { %1777 = vmatpush.xpose.msk.msrb.mxu1 %vm433_vm0, %v2462_v41  ;;  %1796 = vmatpush.xpose.msk.msrb.mxu2 %vm433_vm0, %v2523_v58 }
  0x73   : > { %1813 = vmatpush.xpose.msk.msrb.mxu3 %vm433_vm0, %v2529_v60 }
  0x75   : > { %1761 = vmatpush.xpose.msk.msrb.mxu0 %vm433_vm0, %v2481_v46 }
  0x76   : > { %1778 = vmatpush.xpose.msk.msrb.mxu1 %vm433_vm0, %v2487_v48  ;;  %1797 = vmatpush.xpose.msk.msrb.mxu2 %vm433_vm0, %v2551_v5 }
  0x77   : > { %1814 = vmatpush.xpose.msk.msrb.mxu3 %vm433_vm0, %v2558_v13 }
  0x79   : > { %1762 = vmatpush.xpose.msk.msrb.mxu0 %vm433_vm0, %v2511_v56 }
  0x7a   : > { %1779 = vmatpush.xpose.msk.msrb.mxu1 %vm433_vm0, %v2514_v57  ;;  %1798 = vmatpush.xpose.msk.msrb.mxu2 %vm433_vm0, %v2575_v27 }
  0x7b   : > { %1815 = vmatpush.xpose.msk.msrb.mxu3 %vm433_vm0, %v2581_v35 }
  0x7d   : > { %1763 = vmatpush.xpose.msk.msrb.mxu0 %vm433_vm0, %v2533_v62 }
  0x7e   : > { %1780 = vmatpush.xpose.msk.msrb.mxu1 %vm433_vm0, %v2539_v3  ;;  %1799 = vmatpush.xpose.msk.msrb.mxu2 %vm433_vm0, %v2603_v51 }
  0x7f   : > { %1816 = vmatpush.xpose.msk.msrb.mxu3 %vm433_vm0, %v2610_v55 }
  0x81   : > { %1764 = vmatpush.xpose.msk.msrb.mxu0 %vm433_vm0, %v2563_v22 }
  0x82   : > { %1781 = vmatpush.xpose.msk.msrb.mxu1 %vm433_vm0, %v2566_v23  ;;  %1800 = vmatpush.xpose.msk.msrb.mxu2 %vm433_vm0, %v2627_v19 }
  0x83   : > { %1817 = vmatpush.xpose.msk.msrb.mxu3 %vm433_vm0, %v2633_v29 }
  0x85   : > { %1765 = vmatpush.xpose.msk.msrb.mxu0 %vm433_vm0, %v2585_v38 }
  0x86   : > { %1782 = vmatpush.xpose.msk.msrb.mxu1 %vm433_vm0, %v2591_v43  ;;  %1801 = vmatpush.xpose.msk.msrb.mxu2 %vm433_vm0, %v2655_v61 }
  0x87   : > { %1818 = vmatpush.xpose.msk.msrb.mxu3 %vm433_vm0, %v2662_v47 }
  0x89   : > { %1766 = vmatpush.xpose.msk.msrb.mxu0 %vm433_vm0, %v4191_v9 }
  0x8a   : > { %1783 = vmatpush.xpose.msk.msrb.mxu1 %vm433_vm0, %v4192_v52  ;;  %1802 = vmatpush.xpose.msk.msrb.mxu2 %vm433_vm0, %v4193_v39 }
  0x8b   : > { %1819 = vmatpush.xpose.msk.msrb.mxu3 %vm433_vm0, %v4194_v6 }
  0x8d   : > { %1767 = vmatpush.xpose.msk.msrb.mxu0 %vm433_vm0, %v4197_v49 }
  0x8e   : > { %1784 = vmatpush.xpose.msk.msrb.mxu1 %vm433_vm0, %v4198_v59  ;;  %1803 = vmatpush.xpose.msk.msrb.mxu2 %vm433_vm0, %v2707_v31 }
  0x8f   : > { %1820 = vmatpush.xpose.msk.msrb.mxu3 %vm433_vm0, %v4199_v20 }
  0x91   : > { %1768 = vmatpush.xpose.msk.msrb.mxu0 %vm433_vm0, %v4202_v2  ;;  %1804 = vmatmul.msk.f32.vlgmr.msrb.gmra.mxu2 %vm433_vm0, %v1787_v0 }
  0x92   : > { %1858 = vmatpush.xpose.msk.msra.mxu2 %vm433_vm0, %v2373_v12  ;;  %1785 = vmatpush.xpose.msk.msrb.mxu1 %vm433_vm0, %v4203_v45  ;;  %v851_v12 = vrot.slane %v2377_v14, 2 }
  0x93   : > { %1875 = vmatpush.xpose.msk.msra.mxu3 %vm433_vm0, %v2385_v16 }
  0x94   : > { %1821 = vmatmul.msk.f32.vlgmr.msrb.gmra.mxu3 %vm433_vm0, %v1787_v0  ;;  %v4204_v0 = vld [vmem:[#allocation5_spill] sm:$0xff]  ;;  %1769 = vmatmul.msk.f32.vlgmr.msrb.gmra.mxu0 %vm433_vm0, %v1752_v7  ;;  %v2982_v8 = vsel %vm779_vm2, %v850_v11, %v851_v12 }
  0x95   : > { %1824 = vmatpush.xpose.msk.msra.mxu0 %vm433_vm0, %v2924_v4  ;;  %v813_v16 = vrot.slane %v4204_v0, 2  ;;  %v4205_v4 = vld [vmem:[#allocation7_spill] sm:$0xff]  ;;  %1786 = vmatmul.msk.f32.vlgmr.msrb.gmra.mxu1 %vm433_vm0, %v1752_v7  ;;  %v846_v7 = vrot.slane %v2435_v32, 2  ;;  %v4207_v0 = vld [vmem:[#allocation13_spill] sm:$0xff] }
  0x96   : > { %1841 = vmatpush.xpose.msk.msra.mxu1 %vm433_vm0, %v2927_v33  ;;  %1859 = vmatpush.xpose.msk.msra.mxu2 %vm433_vm0, %v2395_v18  ;;  %v853_v33 = vrot.slane %v4205_v4, 2  ;;  %v848_v25 = vrot.slane %v4207_v0, 2  ;;  %v4213_v32 = vld [vmem:[#allocation19_spill] sm:$0xff] }
  0x97   : > { %1876 = vmatpush.xpose.msk.msra.mxu3 %vm433_vm0, %v2402_v21  ;;  %v2969_v14 = vsel %vm779_vm2, %v811_v63, %v813_v16  ;;  %v806_v16 = vrot.slane %v2429_v30, 2  ;;  %v845_v63 = vrot.slane %v2462_v41, 2  ;;  %v843_v30 = vrot.slane %v4213_v32, 2 }
  0x98   : > { %v2972_v15 = vsel %vm779_vm2, %v851_v12, %v853_v33  ;;  %v4206_v33 = vld [vmem:[#allocation11_spill] sm:$0xff]  ;;  %v805_v12 = vrot.slane %v2459_v40, 2  ;;  %v3006_v11 = vsel %vm779_vm2, %v846_v7, %v848_v25  ;;  %v801_v25 = vrot.slane %v2481_v46, 2  ;;  %v4220_v46 = vld [vmem:[#allocation25_spill] sm:$0xff] }
  0x99   : > { %1825 = vmatpush.xpose.msk.msra.mxu0 %vm433_vm0, %v2943_v10  ;;  %v808_v4 = vrot.slane %v4206_v33, 2  ;;  %4209 = vst [vmem:[#allocation7_spill] sm:$0xff] %v3006_v11  ;;  %v3016_v0 = vsel %vm779_vm2, %v845_v63, %v846_v7  ;;  %v841_v40 = vrot.slane %v2487_v48, 2  ;;  %v840_v7 = vrot.slane %v2514_v57, 2 }
  0x9a   : > { %1842 = vmatpush.xpose.msk.msra.mxu1 %vm433_vm0, %v2946_v54  ;;  %1860 = vmatpush.xpose.msk.msra.mxu2 %vm433_vm0, %v2419_v26  ;;  %v3013_v33 = vsel %vm779_vm2, %v805_v12, %v806_v16  ;;  %4211 = vst [vmem:[#allocation13_spill] sm:$0xff] %v3016_v0  ;;  %v780_v63 = vrot.slane %v2725_v36, 2  ;;  %v836_v48 = vrot.slane %v2539_v3, 2  ;;  %v838_v24 = vrot.slane %v4220_v46, 2  ;;  %v4227_v3 = vld [vmem:[#allocation31_spill] sm:$0xff] }
  0x9b   : > { %1877 = vmatpush.xpose.msk.msra.mxu3 %vm433_vm0, %v2425_v28  ;;  %v3003_v17 = vsel %vm779_vm2, %v806_v16, %v808_v4  ;;  %4210 = vst [vmem:[#allocation11_spill] sm:$0xff] %v3013_v33  ;;  %v4212_v4 = vld [vmem:[#allocation17_spill] sm:$0xff]  ;;  %v800_v16 = vrot.slane %v2511_v56, 2  ;;  %v3040_v32 = vsel %vm779_vm2, %v841_v40, %v843_v30  ;;  %v3052_v56 = vsel %vm779_vm2, %v840_v7, %v841_v40 }
  0x9c   : > { %4208 = vst [vmem:[#allocation5_spill] sm:$0xff] %v3003_v17  ;;  %v803_v41 = vrot.slane %v4212_v4, 2  ;;  %v4216_v4 = vld [vmem:[#allocation47_spill] sm:$0xff]  ;;  %v796_v30 = vrot.slane %v2533_v62, 2  ;;  %v795_v40 = vrot.slane %v2563_v22, 2  ;;  %v835_v7 = vrot.slane %v2566_v23, 2 }
  0x9d   : > { %1826 = vmatpush.xpose.msk.msra.mxu0 %vm433_vm0, %v2969_v14  ;;  %4215 = vst [vmem:[#allocation19_spill] sm:$0xff] %v3040_v32  ;;  %v3049_v57 = vsel %vm779_vm2, %v800_v16, %v801_v25  ;;  %v831_v22 = vrot.slane %v2591_v43, 2  ;;  %v833_v62 = vrot.slane %v4227_v3, 2  ;;  %v4233_v43 = vld [vmem:[#allocation40_spill] sm:$0xff] }
  0x9e   : > { %1843 = vmatpush.xpose.msk.msra.mxu1 %vm433_vm0, %v2972_v15  ;;  %1861 = vmatpush.xpose.msk.msra.mxu2 %vm433_vm0, %v2447_v34  ;;  %v3037_v12 = vsel %vm779_vm2, %v801_v25, %v803_v41  ;;  %4217 = vst [vmem:[#allocation47_spill] sm:$0xff] %v3049_v57  ;;  %v4219_v41 = vld [vmem:[#allocation23_spill] sm:$0xff]  ;;  %v4221_v25 = vrot.slane %v4216_v4, 2 }
  0x9f   : > { %1878 = vmatpush.xpose.msk.msra.mxu3 %vm433_vm0, %v2454_v37  ;;  %4214 = vst [vmem:[#allocation17_spill] sm:$0xff] %v3037_v12  ;;  %v798_v36 = vrot.slane %v4219_v41, 2  ;;  %v3088_v41 = vsel %vm779_vm2, %v795_v40, %v796_v30  ;;  %v3115_v3 = vsel %vm779_vm2, %v831_v22, %v833_v62  ;;  %v786_v62 = vrot.slane %v4197_v49, 2 }
  0xa0   : > { %4218 = vst [vmem:[#allocation63_spill] sm:$0xff] %v3052_v56  ;;  %v3065_v16 = vsel %vm779_vm2, %v780_v63, %v4221_v25  ;;  %v3081_v63 = vsel %vm779_vm2, %v836_v48, %v838_v24  ;;  %v3091_v25 = vsel %vm779_vm2, %v835_v7, %v836_v48  ;;  %v791_v24 = vrot.slane %v2585_v38, 2 }
  0xa1   : > { %1827 = vmatpush.xpose.msk.msra.mxu0 %vm433_vm0, %v2979_v1  ;;  %v3078_v46 = vsel %vm779_vm2, %v796_v30, %v798_v36  ;;  %4223 = vst [vmem:[#allocation25_spill] sm:$0xff] %v3081_v63  ;;  %v4226_v36 = vld [vmem:[#allocation29_spill] sm:$0xff]  ;;  %v790_v48 = vrot.slane %v4191_v9, 2  ;;  %v830_v30 = vrot.slane %v4192_v52, 2  ;;  %v826_v9 = vrot.slane %v4198_v59, 2  ;;  %v4240_v59 = vld [vmem:[#allocation50_spill] sm:$0xff] }
  0xa2   : > { %1844 = vmatpush.xpose.msk.msra.mxu1 %vm433_vm0, %v2982_v8  ;;  %1862 = vmatpush.xpose.msk.msra.mxu2 %vm433_vm0, %v2471_v42  ;;  %4222 = vst [vmem:[#allocation23_spill] sm:$0xff] %v3078_v46  ;;  %v793_v23 = vrot.slane %v4226_v36, 2  ;;  %v828_v38 = vrot.slane %v4233_v43, 2  ;;  %v825_v43 = vrot.slane %v4203_v45, 2  ;;  %v4239_v45 = vld [vmem:[#allocation49_spill] sm:$0xff]  ;;  %v823_v49 = vrot.slane %v4240_v59, 2 }
  0xa3   : > { %1879 = vmatpush.xpose.msk.msra.mxu3 %vm433_vm0, %v2477_v44  ;;  %4224 = vst [vmem:[#allocation64_spill] sm:$0xff] %v3088_v41  ;;  %v3122_v7 = vsel %vm779_vm2, %v790_v48, %v791_v24  ;;  %v3125_v36 = vsel %vm779_vm2, %v830_v30, %v831_v22  ;;  %v785_v22 = vrot.slane %v4202_v2, 2  ;;  %v821_v2 = vrot.slane %v4239_v45, 2 }
  0xa4   : > { %4225 = vst [vmem:[#allocation65_spill] sm:$0xff] %v3091_v25  ;;  %v3112_v40 = vsel %vm779_vm2, %v791_v24, %v793_v23  ;;  %v4232_v23 = vld [vmem:[#allocation38_spill] sm:$0xff]  ;;  %v3148_v48 = vsel %vm779_vm2, %v826_v9, %v828_v38  ;;  %v3163_v38 = vsel %vm779_vm2, %v825_v43, %v826_v9  ;;  %v4245_v43 = vrot.slane %v4216_v4, 2  ;;  %v4249_v4 = vld [vmem:[#allocation61_spill] sm:$0xff] }
  0xa5   : > { %1828 = vmatpush.xpose.msk.msra.mxu0 %vm433_vm0, %v3003_v17  ;;  %4228 = vst [vmem:[#allocation29_spill] sm:$0xff] %v3112_v40  ;;  %v788_v52 = vrot.slane %v4232_v23, 2  ;;  %v3156_v30 = vsel %vm779_vm2, %v785_v22, %v786_v62  ;;  %v4243_v22 = vld [vmem:[#allocation56_spill] sm:$0xff]  ;;  %v4244_v9 = vld [vmem:[#allocation58_spill] sm:$0xff] }
  0xa6   : > { %1845 = vmatpush.xpose.msk.msra.mxu1 %vm433_vm0, %v3006_v11  ;;  %1863 = vmatpush.xpose.msk.msra.mxu2 %vm433_vm0, %v2499_v50  ;;  %4229 = vst [vmem:[#allocation31_spill] sm:$0xff] %v3115_v3 }
  0xa7   : > { %1880 = vmatpush.xpose.msk.msra.mxu3 %vm433_vm0, %v2506_v53  ;;  %4230 = vst [vmem:[#allocation66_spill] sm:$0xff] %v3122_v7  ;;  %v3145_v24 = vsel %vm779_vm2, %v786_v62, %v788_v52  ;;  %v4238_v52 = vld [vmem:[#allocation48_spill] sm:$0xff] }
  0xa8   : > { %4231 = vst [vmem:[#allocation67_spill] sm:$0xff] %v3125_v36  ;;  %v783_v23 = vrot.slane %v4238_v52, 2  ;;  %v3182_v52 = vsel %vm779_vm2, %v821_v2, %v823_v49 }
  0xa9   : > { %1829 = vmatpush.xpose.msk.msra.mxu0 %vm433_vm0, %v3013_v33  ;;  %4234 = vst [vmem:[#allocation38_spill] sm:$0xff] %v3145_v24 }
  0xaa   : > { %1846 = vmatpush.xpose.msk.msra.mxu1 %vm433_vm0, %v3016_v0  ;;  %1864 = vmatpush.xpose.msk.msra.mxu2 %vm433_vm0, %v2523_v58  ;;  %4235 = vst [vmem:[#allocation40_spill] sm:$0xff] %v3148_v48  ;;  %v784_v59 = vsel %vm779_vm2, %v4245_v43, %v783_v23  ;;  %v1822_v43 = vld [vmem:[%s3987_s1 + $0x20] sm:$0xff] }
  0xab   : > { %1881 = vmatpush.xpose.msk.msra.mxu3 %vm433_vm0, %v2529_v60  ;;  %4236 = vst [vmem:[#allocation68_spill] sm:$0xff] %v3156_v30 }
  0xac   : > { %4237 = vst [vmem:[#allocation69_spill] sm:$0xff] %v3163_v38 }
  0xad   : > { %1830 = vmatpush.xpose.msk.msra.mxu0 %vm433_vm0, %v3037_v12 }
  0xae   : > { %1847 = vmatpush.xpose.msk.msra.mxu1 %vm433_vm0, %v3040_v32  ;;  %1865 = vmatpush.xpose.msk.msra.mxu2 %vm433_vm0, %v2551_v5 }
  0xaf   : > { %1882 = vmatpush.xpose.msk.msra.mxu3 %vm433_vm0, %v2558_v13 }
  0xb1   : > { %1831 = vmatpush.xpose.msk.msra.mxu0 %vm433_vm0, %v3049_v57 }
  0xb2   : > { %1848 = vmatpush.xpose.msk.msra.mxu1 %vm433_vm0, %v3052_v56  ;;  %1866 = vmatpush.xpose.msk.msra.mxu2 %vm433_vm0, %v2575_v27 }
  0xb3   : > { %1883 = vmatpush.xpose.msk.msra.mxu3 %vm433_vm0, %v2581_v35 }
  0xb5   : > { %1832 = vmatpush.xpose.msk.msra.mxu0 %vm433_vm0, %v3078_v46 }
  0xb6   : > { %1849 = vmatpush.xpose.msk.msra.mxu1 %vm433_vm0, %v3081_v63  ;;  %1867 = vmatpush.xpose.msk.msra.mxu2 %vm433_vm0, %v2603_v51 }
  0xb7   : > { %1884 = vmatpush.xpose.msk.msra.mxu3 %vm433_vm0, %v2610_v55 }
  0xb9   : > { %1833 = vmatpush.xpose.msk.msra.mxu0 %vm433_vm0, %v3088_v41 }
  0xba   : > { %1850 = vmatpush.xpose.msk.msra.mxu1 %vm433_vm0, %v3091_v25  ;;  %1868 = vmatpush.xpose.msk.msra.mxu2 %vm433_vm0, %v2627_v19 }
  0xbb   : > { %1885 = vmatpush.xpose.msk.msra.mxu3 %vm433_vm0, %v2633_v29 }
  0xbd   : > { %1834 = vmatpush.xpose.msk.msra.mxu0 %vm433_vm0, %v3112_v40 }
  0xbe   : > { %1851 = vmatpush.xpose.msk.msra.mxu1 %vm433_vm0, %v3115_v3  ;;  %1869 = vmatpush.xpose.msk.msra.mxu2 %vm433_vm0, %v2655_v61 }
  0xbf   : > { %1886 = vmatpush.xpose.msk.msra.mxu3 %vm433_vm0, %v2662_v47 }
  0xc1   : > { %1835 = vmatpush.xpose.msk.msra.mxu0 %vm433_vm0, %v3122_v7 }
  0xc2   : > { %1852 = vmatpush.xpose.msk.msra.mxu1 %vm433_vm0, %v3125_v36  ;;  %1870 = vmatpush.xpose.msk.msra.mxu2 %vm433_vm0, %v4193_v39 }
  0xc3   : > { %1887 = vmatpush.xpose.msk.msra.mxu3 %vm433_vm0, %v4194_v6  ;;  %v4241_v6 = vld [vmem:[#allocation52_spill] sm:$0xff] }
  0xc4   : > { %v1060_v39 = vrot.slane %v4241_v6, 2  ;;  %v4247_v6 = vld [vmem:[#allocation57_spill] sm:$0xff] }
  0xc5   : > { %1836 = vmatpush.xpose.msk.msra.mxu0 %vm433_vm0, %v3145_v24  ;;  %v1059_v45 = vrot.slane %v4247_v6, 2 }
  0xc6   : > { %1853 = vmatpush.xpose.msk.msra.mxu1 %vm433_vm0, %v3148_v48  ;;  %1871 = vmatpush.xpose.msk.msra.mxu2 %vm433_vm0, %v2707_v31  ;;  %v4242_v48 = vld [vmem:[#allocation53_spill] sm:$0xff] }
  0xc7   : > { %1888 = vmatpush.xpose.msk.msra.mxu3 %vm433_vm0, %v4199_v20  ;;  %v1062_v62 = vrot.slane %v4242_v48, 2  ;;  %v4246_v48 = vld [vmem:[#allocation55_spill] sm:$0xff]  ;;  %v3204_v23 = vsel %vm779_vm2, %v1059_v45, %v1060_v39  ;;  %v4251_v45 = vld [vmem:[#allocation62_spill] sm:$0xff] }
  0xc8   : > { %v820_v20 = vrot.slane %v4246_v48, 2 }
  0xc9   : > { %1837 = vmatpush.xpose.msk.msra.mxu0 %vm433_vm0, %v3156_v30  ;;  %v3186_v31 = vsel %vm779_vm2, %v1060_v39, %v1062_v62  ;;  %v4253_v39 = vld [vmem:[#allocation3_spill] sm:$0xff]  ;;  %v4255_v62 = vld [vmem:[#allocation6_spill] sm:$0xff] }
  0xca   : > { %1854 = vmatpush.xpose.msk.msra.mxu1 %vm433_vm0, %v3163_v38  ;;  %1872 = vmatpush.xpose.msk.msra.mxu2 %vm433_vm0, %v4243_v22  ;;  %v4248_v22 = vld [vmem:[#allocation60_spill] sm:$0xff]  ;;  %v3197_v49 = vsel %vm779_vm2, %v820_v20, %v821_v2  ;;  %v4250_v2 = vld [vmem:[#allocation59_spill] sm:$0xff]  ;;  %v4252_v20 = vld [vmem:[#allocation2_spill] sm:$0xff] }
  0xcb   : > { %1889 = vmatpush.xpose.msk.msra.mxu3 %vm433_vm0, %v4244_v9 }
  0xcd   : > { %1838 = vmatpush.xpose.msk.msra.mxu0 %vm433_vm0, %v784_v59  ;;  %v1823_v59 = vld [vmem:[%s3987_s1 + $0x28] sm:$0xff] }
  0xce   : > { %1855 = vmatpush.xpose.msk.msra.mxu1 %vm433_vm0, %v3182_v52  ;;  %1873 = vmatpush.xpose.msk.msra.mxu2 %vm433_vm0, %v4248_v22  ;;  %v4256_v22 = vld [vmem:[#allocation40_spill] sm:$0xff] }
  0xcf   : > { %1890 = vmatpush.xpose.msk.msra.mxu3 %vm433_vm0, %v4249_v4 }
  0xd1   : > { %1839 = vmatpush.xpose.msk.msra.mxu0 %vm433_vm0, %v3065_v16  ;;  %v4254_v16 = vld [vmem:[#allocation4_spill] sm:$0xff]  ;;  %1874 = vmatmul.msk.f32.vlgmr.msra.gmra.mxu2 %vm433_vm0, %v1822_v43 }
  0xd2   : > { %1928 = vmatpush.xpose.msk.msrb.mxu2 %vm433_vm0, %v3182_v52  ;;  %1856 = vmatpush.xpose.msk.msra.mxu1 %vm433_vm0, %v3197_v49 }
  0xd3   : > { %1945 = vmatpush.xpose.msk.msrb.mxu3 %vm433_vm0, %v3186_v31 }
  0xd4   : > { %1891 = vmatmul.msk.f32.vlgmr.msra.gmra.mxu3 %vm433_vm0, %v1822_v43  ;;  %1840 = vmatmul.msk.f32.vlgmr.msra.gmra.mxu0 %vm433_vm0, %v1823_v59  ;;  %v4257_v43 = vld [vmem:[#allocation45_spill] sm:$0xff] }
  0xd5   : > { %1893 = vmatpush.xpose.msk.msrb.mxu0 %vm433_vm0, %v4244_v9  ;;  %1857 = vmatmul.msk.f32.vlgmr.msra.gmra.mxu1 %vm433_vm0, %v1823_v59  ;;  %v4258_v59 = vld [vmem:[#allocation46_spill] sm:$0xff] }
  0xd6   : > { %1910 = vmatpush.xpose.msk.msrb.mxu1 %vm433_vm0, %v4250_v2  ;;  %1929 = vmatpush.xpose.msk.msrb.mxu2 %vm433_vm0, %v3197_v49 }
  0xd7   : > { %1946 = vmatpush.xpose.msk.msrb.mxu3 %vm433_vm0, %v3204_v23 }
  0xd9   : > { %1894 = vmatpush.xpose.msk.msrb.mxu0 %vm433_vm0, %v4249_v4 }
  0xda   : > { %1911 = vmatpush.xpose.msk.msrb.mxu1 %vm433_vm0, %v4251_v45  ;;  %1930 = vmatpush.xpose.msk.msrb.mxu2 %vm433_vm0, %v4252_v20 }
  0xdb   : > { %1947 = vmatpush.xpose.msk.msrb.mxu3 %vm433_vm0, %v4253_v39 }
  0xdd   : > { %1895 = vmatpush.xpose.msk.msrb.mxu0 %vm433_vm0, %v4254_v16 }
  0xde   : > { %1912 = vmatpush.xpose.msk.msrb.mxu1 %vm433_vm0, %v4255_v62  ;;  %1931 = vmatpush.xpose.msk.msrb.mxu2 %vm433_vm0, %v2943_v10 }
  0xdf   : > { %1948 = vmatpush.xpose.msk.msrb.mxu3 %vm433_vm0, %v2946_v54 }
  0xe1   : > { %1896 = vmatpush.xpose.msk.msrb.mxu0 %vm433_vm0, %v2395_v18 }
  0xe2   : > { %1913 = vmatpush.xpose.msk.msrb.mxu1 %vm433_vm0, %v2402_v21  ;;  %1932 = vmatpush.xpose.msk.msrb.mxu2 %vm433_vm0, %v2969_v14 }
  0xe3   : > { %1949 = vmatpush.xpose.msk.msrb.mxu3 %vm433_vm0, %v2972_v15 }
  0xe5   : > { %1897 = vmatpush.xpose.msk.msrb.mxu0 %vm433_vm0, %v2419_v26 }
  0xe6   : > { %1914 = vmatpush.xpose.msk.msrb.mxu1 %vm433_vm0, %v2425_v28  ;;  %1933 = vmatpush.xpose.msk.msrb.mxu2 %vm433_vm0, %v2979_v1 }
  0xe7   : > { %1950 = vmatpush.xpose.msk.msrb.mxu3 %vm433_vm0, %v2982_v8 }
  0xe9   : > { %1898 = vmatpush.xpose.msk.msrb.mxu0 %vm433_vm0, %v2447_v34 }
  0xea   : > { %1915 = vmatpush.xpose.msk.msrb.mxu1 %vm433_vm0, %v2454_v37  ;;  %1934 = vmatpush.xpose.msk.msrb.mxu2 %vm433_vm0, %v3003_v17  ;;  %v4287_v17 = vld [vmem:[#allocation44_spill] sm:$0xff] }
  0xeb   : > { %1951 = vmatpush.xpose.msk.msrb.mxu3 %vm433_vm0, %v3006_v11  ;;  %v4285_v11 = vld [vmem:[#allocation39_spill] sm:$0xff] }
  0xed   : > { %1899 = vmatpush.xpose.msk.msrb.mxu0 %vm433_vm0, %v2471_v42 }
  0xee   : > { %1916 = vmatpush.xpose.msk.msrb.mxu1 %vm433_vm0, %v2477_v44  ;;  %1935 = vmatpush.xpose.msk.msrb.mxu2 %vm433_vm0, %v3013_v33  ;;  %v4267_v33 = vld [vmem:[#allocation10_spill] sm:$0xff] }
  0xef   : > { %1952 = vmatpush.xpose.msk.msrb.mxu3 %vm433_vm0, %v3016_v0  ;;  %v3389_v0 = vld [vmem:[%s2340_s23 + $0xa8] sm:$0xff] }
  0xf1   : > { %1900 = vmatpush.xpose.msk.msrb.mxu0 %vm433_vm0, %v2499_v50 }
  0xf2   : > { %1917 = vmatpush.xpose.msk.msrb.mxu1 %vm433_vm0, %v2506_v53  ;;  %1936 = vmatpush.xpose.msk.msrb.mxu2 %vm433_vm0, %v3037_v12 }
  0xf3   : > { %1953 = vmatpush.xpose.msk.msrb.mxu3 %vm433_vm0, %v3040_v32 }
  0xf5   : > { %1901 = vmatpush.xpose.msk.msrb.mxu0 %vm433_vm0, %v2523_v58 }
  0xf6   : > { %1918 = vmatpush.xpose.msk.msrb.mxu1 %vm433_vm0, %v2529_v60  ;;  %1937 = vmatpush.xpose.msk.msrb.mxu2 %vm433_vm0, %v3049_v57 }
  0xf7   : > { %1954 = vmatpush.xpose.msk.msrb.mxu3 %vm433_vm0, %v3052_v56 }
  0xf9   : > { %1902 = vmatpush.xpose.msk.msrb.mxu0 %vm433_vm0, %v2551_v5 }
  0xfa   : > { %1919 = vmatpush.xpose.msk.msrb.mxu1 %vm433_vm0, %v2558_v13  ;;  %1938 = vmatpush.xpose.msk.msrb.mxu2 %vm433_vm0, %v3078_v46 }
  0xfb   : > { %1955 = vmatpush.xpose.msk.msrb.mxu3 %vm433_vm0, %v3081_v63  ;;  %v4262_v63 = vld [vmem:[#allocation54_spill] sm:$0xff] }
  0xfd   : > { %1903 = vmatpush.xpose.msk.msrb.mxu0 %vm433_vm0, %v2575_v27 }
  0xfe   : > { %1920 = vmatpush.xpose.msk.msrb.mxu1 %vm433_vm0, %v2581_v35  ;;  %1939 = vmatpush.xpose.msk.msrb.mxu2 %vm433_vm0, %v3088_v41  ;;  %v4261_v41 = vld [vmem:[#allocation51_spill] sm:$0xff] }
  0xff   : > { %1956 = vmatpush.xpose.msk.msrb.mxu3 %vm433_vm0, %v3091_v25  ;;  %v645_v25 = vpop.f32.mrf.mxu3 }
 0x101   : > { %1904 = vmatpush.xpose.msk.msrb.mxu0 %vm433_vm0, %v2603_v51 }
 0x102   : > { %1921 = vmatpush.xpose.msk.msrb.mxu1 %vm433_vm0, %v2610_v55  ;;  %1940 = vmatpush.xpose.msk.msrb.mxu2 %vm433_vm0, %v3112_v40  ;;  %v625_v40 = vpop.f32.mrf.mxu2 }
 0x103   : > { %1957 = vmatpush.xpose.msk.msrb.mxu3 %vm433_vm0, %v3115_v3  ;;  %v4259_v3 = vld [vmem:[#allocation49_spill] sm:$0xff] }
 0x105   : > { %1905 = vmatpush.xpose.msk.msrb.mxu0 %vm433_vm0, %v2627_v19 }
 0x106   : > { %1922 = vmatpush.xpose.msk.msrb.mxu1 %vm433_vm0, %v2633_v29  ;;  %1941 = vmatpush.xpose.msk.msrb.mxu2 %vm433_vm0, %v3122_v7  ;;  %v518_v7 = vpop.f32.mrf.mxu0 }
 0x107   : > { %1958 = vmatpush.xpose.msk.msrb.mxu3 %vm433_vm0, %v3125_v36  ;;  %v538_v36 = vpop.f32.mrf.mxu1 }
 0x108   : > { %v646_v46 = vadd.f32 %v645_v25, %v538_v36 }
 0x109   : > { %1906 = vmatpush.xpose.msk.msrb.mxu0 %vm433_vm0, %v2655_v61 }
 0x10a   : > { %1923 = vmatpush.xpose.msk.msrb.mxu1 %vm433_vm0, %v2662_v47  ;;  %1942 = vmatpush.xpose.msk.msrb.mxu2 %vm433_vm0, %v3145_v24  ;;  %v4260_v24 = vld [vmem:[#allocation52_spill] sm:$0xff] }
 0x10b   : > { %1959 = vmatpush.xpose.msk.msrb.mxu3 %vm433_vm0, %v4256_v22  ;;  %v1927_v22 = vld [vmem:[%s3987_s1 + $0x38] sm:$0xff] }
 0x10d   : > { %1907 = vmatpush.xpose.msk.msrb.mxu0 %vm433_vm0, %v4257_v43 }
 0x10e   : > { %1924 = vmatpush.xpose.msk.msrb.mxu1 %vm433_vm0, %v4258_v59  ;;  %1943 = vmatpush.xpose.msk.msrb.mxu2 %vm433_vm0, %v3156_v30  ;;  %v626_v30 = vadd.f32 %v625_v40, %v518_v7  ;;  %v3371_v40 = vld [vmem:[%s2340_s23 + $0xb0] sm:$0xff] }
 0x10f   : > { %1960 = vmatpush.xpose.msk.msrb.mxu3 %vm433_vm0, %v3163_v38  ;;  %v1892_v38 = vld [vmem:[%s3987_s1 + $0x30] sm:$0xff] }
 0x110   : > { %v3376_v7 = vld [vmem:[%s2340_s23 + $0x170] sm:$0xff] }
 0x111   : > { %1908 = vmatpush.xpose.msk.msrb.mxu0 %vm433_vm0, %v4261_v41  ;;  %1944 = vmatmul.msk.f32.vlgmr.msrb.gmra.mxu2 %vm433_vm0, %v1927_v22 }
 0x112   : > { %2000 = vmatpush.xpose.msk.msra.mxu2 %vm433_vm0, %v4259_v3  ;;  %1925 = vmatpush.xpose.msk.msrb.mxu1 %vm433_vm0, %v4262_v63  ;;  %v696_v25 = vpop.f32.mrf.mxu1 }
 0x113   : > { %2017 = vmatpush.xpose.msk.msra.mxu3 %vm433_vm0, %v4260_v24 }
 0x114   : > { %1961 = vmatmul.msk.f32.vlgmr.msrb.gmra.mxu3 %vm433_vm0, %v1927_v22  ;;  %1909 = vmatmul.msk.f32.vlgmr.msrb.gmra.mxu0 %vm433_vm0, %v1892_v38  ;;  %v676_v22 = vpop.f32.mrf.mxu0  ;;  %v733_v56 = vpop.f32.mrf.mxu2 }
 0x115   : > { %1966 = vmatpush.xpose.msk.msra.mxu0 %vm433_vm0, %v4244_v9  ;;  %1926 = vmatmul.msk.f32.vlgmr.msrb.gmra.mxu1 %vm433_vm0, %v1892_v38  ;;  %v699_v36 = vadd.f32 %v676_v22, %v626_v30  ;;  %v700_v38 = vadd.f32 %v696_v25, %v646_v46  ;;  %v3394_v30 = vld [vmem:[%s2340_s23 + $0x168] sm:$0xff]  ;;  %v3410_v46 = vld [vmem:[%s2340_s23 + $0x158] sm:$0xff] }
 0x116   : > { %1983 = vmatpush.xpose.msk.msra.mxu1 %vm433_vm0, %v4250_v2  ;;  %2001 = vmatpush.xpose.msk.msra.mxu2 %vm433_vm0, %v4246_v48 }
 0x117   : > { %2018 = vmatpush.xpose.msk.msra.mxu3 %vm433_vm0, %v4247_v6  ;;  %v3380_v57 = vadd.f32 %v733_v56, %v699_v36  ;;  %v753_v32 = vpop.f32.mrf.mxu3  ;;  %v4265_v36 = vld [vmem:[#allocation8_spill] sm:$0xff] }
 0x118   : > { %v3382_v12 = vadd.f32 %v753_v32, %v700_v38  ;;  %v3405_v32 = vld [vmem:[%s2340_s23 + $0x98] sm:$0xff] }
 0x119   : > { %1967 = vmatpush.xpose.msk.msra.mxu0 %vm433_vm0, %v4249_v4  ;;  %4263 = vst [vmem:[#allocation48_spill] sm:$0xff] %v3380_v57  ;;  %v762_v22 = vmul.f32 %v3380_v57, %v3380_v57  ;;  %v4266_v38 = vld [vmem:[#allocation9_spill] sm:$0xff] }
 0x11a   : > { %1984 = vmatpush.xpose.msk.msra.mxu1 %vm433_vm0, %v4251_v45  ;;  %2002 = vmatpush.xpose.msk.msra.mxu2 %vm433_vm0, %v3371_v40  ;;  %4264 = vst [vmem:[#allocation50_spill] sm:$0xff] %v3382_v12  ;;  %v758_v56 = vadd.f32 %v3382_v12, %v3380_v57  ;;  %v763_v25 = vmul.f32 %v3382_v12, %v3382_v12  ;;  %v4268_v57 = vld [vmem:[#allocation12_spill] sm:$0xff]  ;;  %v4284_v12 = vld [vmem:[#allocation37_spill] sm:$0xff] }
 0x11b   : > { %2019 = vmatpush.xpose.msk.msra.mxu3 %vm433_vm0, %v3376_v7 }
 0x11c   : > { %759 = vadd.xlane.f32.xlu0 %v758_v56  ;;  %v764_v56 = vadd.f32 %v763_v25, %v762_v22  ;;  %v4273_v22 = vld [vmem:[#allocation20_spill] sm:$0xff]  ;;  %v4274_v25 = vld [vmem:[#allocation21_spill] sm:$0xff] }
 0x11d   : > { %1968 = vmatpush.xpose.msk.msra.mxu0 %vm433_vm0, %v4254_v16 }
 0x11e   : > { %1985 = vmatpush.xpose.msk.msra.mxu1 %vm433_vm0, %v4255_v62  ;;  %2003 = vmatpush.xpose.msk.msra.mxu2 %vm433_vm0, %v3389_v0 }
 0x11f   : > { %2020 = vmatpush.xpose.msk.msra.mxu3 %vm433_vm0, %v3394_v30 }
 0x121   : > { %1969 = vmatpush.xpose.msk.msra.mxu0 %vm433_vm0, %v2395_v18 }
 0x122   : > { %1986 = vmatpush.xpose.msk.msra.mxu1 %vm433_vm0, %v2402_v21  ;;  %2004 = vmatpush.xpose.msk.msra.mxu2 %vm433_vm0, %v3405_v32 }
 0x123   : > { %2021 = vmatpush.xpose.msk.msra.mxu3 %vm433_vm0, %v3410_v46 }
 0x124   : > { %765 = vadd.xlane.f32.xlu0 %v764_v56  ;;  %v4275_v56 = vld [vmem:[#allocation22_spill] sm:$0xff] }
 0x125   : > { %1970 = vmatpush.xpose.msk.msra.mxu0 %vm433_vm0, %v2419_v26 }
 0x126   : > { %1987 = vmatpush.xpose.msk.msra.mxu1 %vm433_vm0, %v2425_v28  ;;  %2005 = vmatpush.xpose.msk.msra.mxu2 %vm433_vm0, %v4265_v36  ;;  %v4269_v36 = vld [vmem:[#allocation14_spill] sm:$0xff] }
 0x127   : > { %2022 = vmatpush.xpose.msk.msra.mxu3 %vm433_vm0, %v4266_v38  ;;  %v4270_v38 = vld [vmem:[#allocation15_spill] sm:$0xff] }
 0x129   : > { %1971 = vmatpush.xpose.msk.msra.mxu0 %vm433_vm0, %v2447_v34 }
 0x12a   : > { %1988 = vmatpush.xpose.msk.msra.mxu1 %vm433_vm0, %v2454_v37  ;;  %2006 = vmatpush.xpose.msk.msra.mxu2 %vm433_vm0, %v4267_v33  ;;  %v4272_v33 = vld [vmem:[#allocation18_spill] sm:$0xff] }
 0x12b   : > { %2023 = vmatpush.xpose.msk.msra.mxu3 %vm433_vm0, %v4268_v57  ;;  %v4271_v57 = vld [vmem:[#allocation16_spill] sm:$0xff] }
 0x12d   : > { %1972 = vmatpush.xpose.msk.msra.mxu0 %vm433_vm0, %v2471_v42 }
 0x12e   : > { %1989 = vmatpush.xpose.msk.msra.mxu1 %vm433_vm0, %v2477_v44  ;;  %2007 = vmatpush.xpose.msk.msra.mxu2 %vm433_vm0, %v4269_v36  ;;  %v4276_v36 = vld [vmem:[#allocation24_spill] sm:$0xff] }
 0x12f   : > { %2024 = vmatpush.xpose.msk.msra.mxu3 %vm433_vm0, %v4270_v38  ;;  %v4277_v38 = vld [vmem:[#allocation26_spill] sm:$0xff] }
 0x131   : > { %1973 = vmatpush.xpose.msk.msra.mxu0 %vm433_vm0, %v2499_v50 }
 0x132   : > { %1990 = vmatpush.xpose.msk.msra.mxu1 %vm433_vm0, %v2506_v53  ;;  %2008 = vmatpush.xpose.msk.msra.mxu2 %vm433_vm0, %v4271_v57  ;;  %v4278_v57 = vld [vmem:[#allocation27_spill] sm:$0xff] }
 0x133   : > { %2025 = vmatpush.xpose.msk.msra.mxu3 %vm433_vm0, %v4272_v33  ;;  %v4279_v33 = vld [vmem:[#allocation28_spill] sm:$0xff] }
 0x135   : > { %1974 = vmatpush.xpose.msk.msra.mxu0 %vm433_vm0, %v2523_v58 }
 0x136   : > { %1991 = vmatpush.xpose.msk.msra.mxu1 %vm433_vm0, %v2529_v60  ;;  %2009 = vmatpush.xpose.msk.msra.mxu2 %vm433_vm0, %v4273_v22  ;;  %v4280_v22 = vld [vmem:[#allocation30_spill] sm:$0xff] }
 0x137   : > { %2026 = vmatpush.xpose.msk.msra.mxu3 %vm433_vm0, %v4274_v25  ;;  %v3487_v25 = vld [vmem:[%s2340_s23 + $0x1a0] sm:$0xff] }
 0x139   : > { %1975 = vmatpush.xpose.msk.msra.mxu0 %vm433_vm0, %v2551_v5 }
 0x13a   : > { %1992 = vmatpush.xpose.msk.msra.mxu1 %vm433_vm0, %v2558_v13  ;;  %2010 = vmatpush.xpose.msk.msra.mxu2 %vm433_vm0, %v4275_v56  ;;  %v3490_v56 = vld [vmem:[%s2340_s23 + $0x1a8] sm:$0x3] }
 0x13b   : > { %2027 = vmatpush.xpose.msk.msra.mxu3 %vm433_vm0, %v4276_v36  ;;  %4281 = vst [vmem:[#allocation53_spill] sm:$0xff] %v3490_v56  ;;  %v4282_v36 = vld [vmem:[#allocation33_spill] sm:$0xff] }
 0x13d   : > { %1976 = vmatpush.xpose.msk.msra.mxu0 %vm433_vm0, %v2575_v27 }
 0x13e   : > { %1993 = vmatpush.xpose.msk.msra.mxu1 %vm433_vm0, %v2581_v35  ;;  %2011 = vmatpush.xpose.msk.msra.mxu2 %vm433_vm0, %v4277_v38  ;;  %v4283_v38 = vld [vmem:[#allocation34_spill] sm:$0xff] }
 0x13f   : > { %2028 = vmatpush.xpose.msk.msra.mxu3 %vm433_vm0, %v4278_v57  ;;  %v1275_v57 = vrot.slane %v3487_v25, 1 }
 0x141   : > { %1977 = vmatpush.xpose.msk.msra.mxu0 %vm433_vm0, %v2603_v51 }
 0x142   : > { %1994 = vmatpush.xpose.msk.msra.mxu1 %vm433_vm0, %v2610_v55  ;;  %2012 = vmatpush.xpose.msk.msra.mxu2 %vm433_vm0, %v4279_v33  ;;  %v1277_v33 = vrot.slane %v3490_v56, 1  ;;  %v4286_v56 = vld [vmem:[#allocation43_spill] sm:$0xff] }
 0x143   : > { %2029 = vmatpush.xpose.msk.msra.mxu3 %vm433_vm0, %v4280_v22  ;;  %v3503_v22 = vld [vmem:[%s2340_s23 + $0x198] sm:$0xff] }
 0x145   : > { %1978 = vmatpush.xpose.msk.msra.mxu0 %vm433_vm0, %v2627_v19 }
 0x146   : > { %1995 = vmatpush.xpose.msk.msra.mxu1 %vm433_vm0, %v2633_v29  ;;  %2013 = vmatpush.xpose.msk.msra.mxu2 %vm433_vm0, %v4282_v36  ;;  %v3510_v36 = vsel %vm350_vm1, %v1275_v57, %v1277_v33  ;;  %v2281_v33 = vld [vmem:[%s2340_s23 + $0x48] sm:$0xff] }
 0x147   : > { %2030 = vmatpush.xpose.msk.msra.mxu3 %vm433_vm0, %v4283_v38  ;;  %v1274_v38 = vrot.slane %v3503_v22, 1 }
 0x149   : > { %1979 = vmatpush.xpose.msk.msra.mxu0 %vm433_vm0, %v2655_v61 }
 0x14a   : > { %1996 = vmatpush.xpose.msk.msra.mxu1 %vm433_vm0, %v2662_v47  ;;  %2014 = vmatpush.xpose.msk.msra.mxu2 %vm433_vm0, %v4284_v12  ;;  %v3526_v12 = vsel %vm350_vm1, %v1274_v38, %v1275_v57  ;;  %v2280_v57 = vld [vmem:[%s2340_s23 + $0x110] sm:$0xff]  ;;  %v2282_v38 = vld [vmem:[%s2340_s23 + $0x108] sm:$0xff] }
 0x14b   : > { %2031 = vmatpush.xpose.msk.msra.mxu3 %vm433_vm0, %v4285_v11 }
 0x14d   : > { %1980 = vmatpush.xpose.msk.msra.mxu0 %vm433_vm0, %v4257_v43 }
 0x14e   : > { %1997 = vmatpush.xpose.msk.msra.mxu1 %vm433_vm0, %v4258_v59  ;;  %2015 = vmatpush.xpose.msk.msra.mxu2 %vm433_vm0, %v4286_v56  ;;  %v2279_v56 = vld [vmem:[%s2340_s23 + $0x50] sm:$0xff] }
 0x14f   : > { %2032 = vmatpush.xpose.msk.msra.mxu3 %vm433_vm0, %v4287_v17 }
 0x151   : > { %1981 = vmatpush.xpose.msk.msra.mxu0 %vm433_vm0, %v4261_v41 }
 0x152   : > { %2070 = vmatpush.xpose.msk.msrb.mxu2 %vm433_vm0, %v4258_v59  ;;  %1998 = vmatpush.xpose.msk.msra.mxu1 %vm433_vm0, %v4262_v63 }
 0x153   : > { %2087 = vmatpush.xpose.msk.msrb.mxu3 %vm433_vm0, %v3510_v36 }
 0x155   : > { %2035 = vmatpush.xpose.msk.msrb.mxu0 %vm433_vm0, %v4285_v11  ;;  %v2269_v11 = vld [vmem:[%s2340_s23 + $0x90] sm:$0xff] }
 0x156   : > { %2052 = vmatpush.xpose.msk.msrb.mxu1 %vm433_vm0, %v3487_v25  ;;  %2071 = vmatpush.xpose.msk.msrb.mxu2 %vm433_vm0, %v4262_v63 }
 0x157   : > { %2088 = vmatpush.xpose.msk.msrb.mxu3 %vm433_vm0, %v3526_v12 }
 0x159   : > { %2036 = vmatpush.xpose.msk.msrb.mxu0 %vm433_vm0, %v4287_v17  ;;  %v1965_v17 = vld [vmem:[%s3987_s1 + $0x48] sm:$0xff] }
 0x15a   : > { %2053 = vmatpush.xpose.msk.msrb.mxu1 %vm433_vm0, %v3503_v22  ;;  %2072 = vmatpush.xpose.msk.msrb.mxu2 %vm433_vm0, %v4244_v9 }
 0x15b   : > { %2089 = vmatpush.xpose.msk.msrb.mxu3 %vm433_vm0, %v4250_v2  ;;  %1982 = vmatmul.msk.f32.vlgmr.msra.gmra.mxu0 %vm433_vm0, %v1965_v17 }
 0x15c   : > { %1999 = vmatmul.msk.f32.vlgmr.msra.gmra.mxu1 %vm433_vm0, %v1965_v17  ;;  %v2284_v17 = vld [vmem:[%s2340_s23 + $0xf8] sm:$0xff] }
 0x15d   : > { %2037 = vmatpush.xpose.msk.msrb.mxu0 %vm433_vm0, %v4259_v3  ;;  %v2271_v3 = vld [vmem:[%s2340_s23 + $0x80] sm:$0xff] }
 0x15e   : > { %2054 = vmatpush.xpose.msk.msrb.mxu1 %vm433_vm0, %v4260_v24  ;;  %2073 = vmatpush.xpose.msk.msrb.mxu2 %vm433_vm0, %v4249_v4  ;;  %v2272_v24 = vld [vmem:[%s2340_s23 + $0x140] sm:$0xff] }
 0x15f   : > { %2090 = vmatpush.xpose.msk.msrb.mxu3 %vm433_vm0, %v4251_v45 }
 0x161   : > { %2038 = vmatpush.xpose.msk.msrb.mxu0 %vm433_vm0, %v4246_v48  ;;  %v2273_v48 = vld [vmem:[%s2340_s23 + $0x78] sm:$0xff] }
 0x162   : > { %2055 = vmatpush.xpose.msk.msrb.mxu1 %vm433_vm0, %v4247_v6  ;;  %2074 = vmatpush.xpose.msk.msrb.mxu2 %vm433_vm0, %v4254_v16  ;;  %v1964_v6 = vld [vmem:[%s3987_s1 + $0x40] sm:$0xff] }
 0x163   : > { %2091 = vmatpush.xpose.msk.msrb.mxu3 %vm433_vm0, %v4255_v62  ;;  %2016 = vmatmul.msk.f32.vlgmr.msra.gmra.mxu2 %vm433_vm0, %v1964_v6 }
 0x164   : > { %2033 = vmatmul.msk.f32.vlgmr.msra.gmra.mxu3 %vm433_vm0, %v1964_v6  ;;  %v2283_v6 = vld [vmem:[%s2340_s23 + $0x38] sm:$0xff] }
 0x165   : > { %2039 = vmatpush.xpose.msk.msrb.mxu0 %vm433_vm0, %v3371_v40  ;;  %v2274_v40 = vld [vmem:[%s2340_s23 + $0x138] sm:$0xff] }
 0x166   : > { %2056 = vmatpush.xpose.msk.msrb.mxu1 %vm433_vm0, %v3376_v7  ;;  %2075 = vmatpush.xpose.msk.msrb.mxu2 %vm433_vm0, %v2395_v18  ;;  %v2275_v7 = vld [vmem:[%s2340_s23 + $0x68] sm:$0xff] }
 0x167   : > { %2092 = vmatpush.xpose.msk.msrb.mxu3 %vm433_vm0, %v2402_v21 }
 0x169   : > { %2040 = vmatpush.xpose.msk.msrb.mxu0 %vm433_vm0, %v3389_v0  ;;  %v2270_v0 = vld [vmem:[%s2340_s23 + $0x150] sm:$0xff] }
 0x16a   : > { %2057 = vmatpush.xpose.msk.msrb.mxu1 %vm433_vm0, %v3394_v30  ;;  %2076 = vmatpush.xpose.msk.msrb.mxu2 %vm433_vm0, %v2419_v26  ;;  %v2276_v30 = vld [vmem:[%s2340_s23 + $0x128] sm:$0xff] }
 0x16b   : > { %2093 = vmatpush.xpose.msk.msrb.mxu3 %vm433_vm0, %v2425_v28 }
 0x16d   : > { %2041 = vmatpush.xpose.msk.msrb.mxu0 %vm433_vm0, %v3405_v32  ;;  %v2277_v32 = vld [vmem:[%s2340_s23 + $0x60] sm:$0xff] }
 0x16e   : > { %2058 = vmatpush.xpose.msk.msrb.mxu1 %vm433_vm0, %v3410_v46  ;;  %2077 = vmatpush.xpose.msk.msrb.mxu2 %vm433_vm0, %v2447_v34  ;;  %v2278_v46 = vld [vmem:[%s2340_s23 + $0x120] sm:$0xff] }
 0x16f   : > { %2094 = vmatpush.xpose.msk.msrb.mxu3 %vm433_vm0, %v2454_v37 }
 0x171   : > { %2042 = vmatpush.xpose.msk.msrb.mxu0 %vm433_vm0, %v2269_v11  ;;  %v946_v11 = vpop.f32.mrf.mxu0 }
 0x172   : > { %2059 = vmatpush.xpose.msk.msrb.mxu1 %vm433_vm0, %v2270_v0  ;;  %2078 = vmatpush.xpose.msk.msrb.mxu2 %vm433_vm0, %v2471_v42  ;;  %v966_v0 = vpop.f32.mrf.mxu1 }
 0x173   : > { %2095 = vmatpush.xpose.msk.msrb.mxu3 %vm433_vm0, %v2477_v44 }
 0x175   : > { %2043 = vmatpush.xpose.msk.msrb.mxu0 %vm433_vm0, %v2271_v3  ;;  %v2069_v3 = vld [vmem:[%s3987_s1 + $0x58] sm:$0xff] }
 0x176   : > { %2060 = vmatpush.xpose.msk.msrb.mxu1 %vm433_vm0, %v2272_v24  ;;  %2079 = vmatpush.xpose.msk.msrb.mxu2 %vm433_vm0, %v2499_v50  ;;  %v989_v24 = vpop.f32.mrf.mxu2 }
 0x177   : > { %2096 = vmatpush.xpose.msk.msrb.mxu3 %vm433_vm0, %v2506_v53 }
 0x179   : > { %2044 = vmatpush.xpose.msk.msrb.mxu0 %vm433_vm0, %v2273_v48  ;;  %v1009_v48 = vpop.f32.mrf.mxu3 }
 0x17a   : > { %2061 = vmatpush.xpose.msk.msrb.mxu1 %vm433_vm0, %v2274_v40  ;;  %2080 = vmatpush.xpose.msk.msrb.mxu2 %vm433_vm0, %v2523_v58  ;;  %v2285_v40 = vld [vmem:[%s2340_s23 + $0x30] sm:$0xff] }
 0x17b   : > { %2097 = vmatpush.xpose.msk.msrb.mxu3 %vm433_vm0, %v2529_v60 }
 0x17d   : > { %2045 = vmatpush.xpose.msk.msrb.mxu0 %vm433_vm0, %v2275_v7  ;;  %v2286_v7 = vld [vmem:[%s2340_s23 + $0xf0] sm:$0xff] }
 0x17e   : > { %2062 = vmatpush.xpose.msk.msrb.mxu1 %vm433_vm0, %v2276_v30  ;;  %2081 = vmatpush.xpose.msk.msrb.mxu2 %vm433_vm0, %v2551_v5  ;;  %v2034_v30 = vld [vmem:[%s3987_s1 + $0x50] sm:$0xff] }
 0x17f   : > { %2098 = vmatpush.xpose.msk.msrb.mxu3 %vm433_vm0, %v2558_v13 }
 0x181   : > { %2046 = vmatpush.xpose.msk.msrb.mxu0 %vm433_vm0, %v2277_v32  ;;  %v990_v32 = vadd.f32 %v989_v24, %v946_v11 }
 0x182   : > { %2063 = vmatpush.xpose.msk.msrb.mxu1 %vm433_vm0, %v2278_v46  ;;  %2082 = vmatpush.xpose.msk.msrb.mxu2 %vm433_vm0, %v2575_v27  ;;  %v1010_v46 = vadd.f32 %v1009_v48, %v966_v0 }
 0x183   : > { %2099 = vmatpush.xpose.msk.msrb.mxu3 %vm433_vm0, %v2581_v35 }
 0x185   : > { %2047 = vmatpush.xpose.msk.msrb.mxu0 %vm433_vm0, %v2279_v56 }
 0x186   : > { %2064 = vmatpush.xpose.msk.msrb.mxu1 %vm433_vm0, %v2280_v57  ;;  %2083 = vmatpush.xpose.msk.msrb.mxu2 %vm433_vm0, %v2603_v51 }
 0x187   : > { %2100 = vmatpush.xpose.msk.msrb.mxu3 %vm433_vm0, %v2610_v55 }
 0x189   : > { %2048 = vmatpush.xpose.msk.msrb.mxu0 %vm433_vm0, %v2281_v33 }
 0x18a   : > { %2065 = vmatpush.xpose.msk.msrb.mxu1 %vm433_vm0, %v2282_v38  ;;  %2084 = vmatpush.xpose.msk.msrb.mxu2 %vm433_vm0, %v2627_v19 }
 0x18b   : > { %2101 = vmatpush.xpose.msk.msrb.mxu3 %vm433_vm0, %v2633_v29 }
 0x18d   : > { %2049 = vmatpush.xpose.msk.msrb.mxu0 %vm433_vm0, %v2283_v6 }
 0x18e   : > { %2066 = vmatpush.xpose.msk.msrb.mxu1 %vm433_vm0, %v2284_v17  ;;  %2085 = vmatpush.xpose.msk.msrb.mxu2 %vm433_vm0, %v2655_v61 }
 0x18f   : > { %2102 = vmatpush.xpose.msk.msrb.mxu3 %vm433_vm0, %v2662_v47 }
 0x191   : > { %2050 = vmatpush.xpose.msk.msrb.mxu0 %vm433_vm0, %v2285_v40  ;;  %2086 = vmatmul.msk.f32.vlgmr.msrb.gmra.mxu2 %vm433_vm0, %v2069_v3  ;;  %v1034_v56 = vpop.f32.mrf.mxu0 }
 0x192   : > { %2142 = vmatpush.xpose.msk.msra.mxu2 %vm433_vm0, %v4244_v9  ;;  %2067 = vmatpush.xpose.msk.msrb.mxu1 %vm433_vm0, %v2286_v7  ;;  %v1054_v57 = vpop.f32.mrf.mxu1  ;;  %v1057_v33 = vadd.f32 %v1034_v56, %v990_v32  ;;  %v4290_v7 = vld [vmem:[#allocation5_spill] sm:$0xff]  ;;  %v4292_v32 = vld [vmem:[#allocation11_spill] sm:$0xff] }
 0x193   : > { %2159 = vmatpush.xpose.msk.msra.mxu3 %vm433_vm0, %v4250_v2  ;;  %v1058_v38 = vadd.f32 %v1054_v57, %v1010_v46  ;;  %v4293_v46 = vld [vmem:[#allocation13_spill] sm:$0xff]  ;;  %v4295_v57 = vld [vmem:[#allocation19_spill] sm:$0xff] }
 0x194   : > { %2103 = vmatmul.msk.f32.vlgmr.msrb.gmra.mxu3 %vm433_vm0, %v2069_v3  ;;  %2051 = vmatmul.msk.f32.vlgmr.msrb.gmra.mxu0 %vm433_vm0, %v2034_v30  ;;  %v1090_v6 = vpop.f32.mrf.mxu2  ;;  %v4294_v56 = vld [vmem:[#allocation17_spill] sm:$0xff] }
 0x195   : > { %2108 = vmatpush.xpose.msk.msra.mxu0 %vm433_vm0, %v3182_v52  ;;  %2068 = vmatmul.msk.f32.vlgmr.msrb.gmra.mxu1 %vm433_vm0, %v2034_v30  ;;  %v3696_v11 = vadd.f32 %v1090_v6, %v1057_v33  ;;  %v4291_v30 = vld [vmem:[#allocation7_spill] sm:$0xff] }
 0x196   : > { %2125 = vmatpush.xpose.msk.msra.mxu1 %vm433_vm0, %v3186_v31  ;;  %2143 = vmatpush.xpose.msk.msra.mxu2 %vm433_vm0, %v4249_v4  ;;  %v4296_v33 = vld [vmem:[#allocation47_spill] sm:$0xff] }
 0x197   : > { %2160 = vmatpush.xpose.msk.msra.mxu3 %vm433_vm0, %v4251_v45  ;;  %v1110_v17 = vpop.f32.mrf.mxu3  ;;  %4288 = vst [vmem:[#allocation56_spill] sm:$0xff] %v3696_v11  ;;  %v1119_v24 = vmul.f32 %v3696_v11, %v3696_v11  ;;  %v4298_v6 = vld [vmem:[#allocation23_spill] sm:$0xff] }
 0x198   : > { %v3698_v0 = vadd.f32 %v1110_v17, %v1058_v38  ;;  %v4297_v38 = vld [vmem:[#allocation63_spill] sm:$0xff]  ;;  %v4299_v17 = vld [vmem:[#allocation25_spill] sm:$0xff] }
 0x199   : > { %2109 = vmatpush.xpose.msk.msra.mxu0 %vm433_vm0, %v3197_v49 }
 0x19a   : > { %2126 = vmatpush.xpose.msk.msra.mxu1 %vm433_vm0, %v3204_v23  ;;  %2144 = vmatpush.xpose.msk.msra.mxu2 %vm433_vm0, %v4254_v16  ;;  %4289 = vst [vmem:[#allocation58_spill] sm:$0xff] %v3698_v0  ;;  %v1115_v3 = vadd.f32 %v3698_v0, %v3696_v11  ;;  %v1120_v48 = vmul.f32 %v3698_v0, %v3698_v0  ;;  %v1483_v0 = vrot.slane %v3487_v25, 2  ;;  %v4304_v11 = vld [vmem:[#allocation53_spill] sm:$0xff]  ;;  %v4308_v25 = vld [vmem:[#allocation40_spill] sm:$0xff] }
 0x19b   : > { %2161 = vmatpush.xpose.msk.msra.mxu3 %vm433_vm0, %v4255_v62 }
 0x19c   : > { %1116 = vadd.xlane.f32.xlu1 %v1115_v3  ;;  %v1121_v40 = vadd.f32 %v1120_v48, %v1119_v24  ;;  %v4300_v3 = vld [vmem:[#allocation64_spill] sm:$0xff]  ;;  %v4301_v24 = vld [vmem:[#allocation65_spill] sm:$0xff] }
 0x19d   : > { %2110 = vmatpush.xpose.msk.msra.mxu0 %vm433_vm0, %v4252_v20  ;;  %v4302_v48 = vld [vmem:[#allocation29_spill] sm:$0xff] }
 0x19e   : > { %2127 = vmatpush.xpose.msk.msra.mxu1 %vm433_vm0, %v4253_v39  ;;  %2145 = vmatpush.xpose.msk.msra.mxu2 %vm433_vm0, %v2395_v18 }
 0x19f   : > { %2162 = vmatpush.xpose.msk.msra.mxu3 %vm433_vm0, %v2402_v21 }
 0x1a1   : > { %2111 = vmatpush.xpose.msk.msra.mxu0 %vm433_vm0, %v2943_v10 }
 0x1a2   : > { %2128 = vmatpush.xpose.msk.msra.mxu1 %vm433_vm0, %v2946_v54  ;;  %2146 = vmatpush.xpose.msk.msra.mxu2 %vm433_vm0, %v2419_v26 }
 0x1a3   : > { %2163 = vmatpush.xpose.msk.msra.mxu3 %vm433_vm0, %v2425_v28 }
 0x1a4   : > { %1122 = vadd.xlane.f32.xlu1 %v1121_v40  ;;  %v4303_v40 = vld [vmem:[#allocation31_spill] sm:$0xff] }
 0x1a5   : > { %2112 = vmatpush.xpose.msk.msra.mxu0 %vm433_vm0, %v2969_v14 }
 0x1a6   : > { %2129 = vmatpush.xpose.msk.msra.mxu1 %vm433_vm0, %v2972_v15  ;;  %2147 = vmatpush.xpose.msk.msra.mxu2 %vm433_vm0, %v2447_v34 }
 0x1a7   : > { %2164 = vmatpush.xpose.msk.msra.mxu3 %vm433_vm0, %v2454_v37 }
 0x1a9   : > { %2113 = vmatpush.xpose.msk.msra.mxu0 %vm433_vm0, %v2979_v1 }
 0x1aa   : > { %2130 = vmatpush.xpose.msk.msra.mxu1 %vm433_vm0, %v2982_v8  ;;  %2148 = vmatpush.xpose.msk.msra.mxu2 %vm433_vm0, %v2471_v42 }
 0x1ab   : > { %2165 = vmatpush.xpose.msk.msra.mxu3 %vm433_vm0, %v2477_v44 }
 0x1ad   : > { %2114 = vmatpush.xpose.msk.msra.mxu0 %vm433_vm0, %v4290_v7 }
 0x1ae   : > { %2131 = vmatpush.xpose.msk.msra.mxu1 %vm433_vm0, %v4291_v30  ;;  %2149 = vmatpush.xpose.msk.msra.mxu2 %vm433_vm0, %v2499_v50 }
 0x1af   : > { %2166 = vmatpush.xpose.msk.msra.mxu3 %vm433_vm0, %v2506_v53 }
 0x1b1   : > { %2115 = vmatpush.xpose.msk.msra.mxu0 %vm433_vm0, %v4292_v32 }
 0x1b2   : > { %2132 = vmatpush.xpose.msk.msra.mxu1 %vm433_vm0, %v4293_v46  ;;  %2150 = vmatpush.xpose.msk.msra.mxu2 %vm433_vm0, %v2523_v58 }
 0x1b3   : > { %2167 = vmatpush.xpose.msk.msra.mxu3 %vm433_vm0, %v2529_v60 }
 0x1b5   : > { %2116 = vmatpush.xpose.msk.msra.mxu0 %vm433_vm0, %v4294_v56 }
 0x1b6   : > { %2133 = vmatpush.xpose.msk.msra.mxu1 %vm433_vm0, %v4295_v57  ;;  %2151 = vmatpush.xpose.msk.msra.mxu2 %vm433_vm0, %v2551_v5 }
 0x1b7   : > { %2168 = vmatpush.xpose.msk.msra.mxu3 %vm433_vm0, %v2558_v13 }
 0x1b9   : > { %2117 = vmatpush.xpose.msk.msra.mxu0 %vm433_vm0, %v4296_v33 }
 0x1ba   : > { %2134 = vmatpush.xpose.msk.msra.mxu1 %vm433_vm0, %v4297_v38  ;;  %2152 = vmatpush.xpose.msk.msra.mxu2 %vm433_vm0, %v2575_v27 }
 0x1bb   : > { %2169 = vmatpush.xpose.msk.msra.mxu3 %vm433_vm0, %v2581_v35 }
 0x1bd   : > { %2118 = vmatpush.xpose.msk.msra.mxu0 %vm433_vm0, %v4298_v6 }
 0x1be   : > { %2135 = vmatpush.xpose.msk.msra.mxu1 %vm433_vm0, %v4299_v17  ;;  %2153 = vmatpush.xpose.msk.msra.mxu2 %vm433_vm0, %v2603_v51 }
 0x1bf   : > { %2170 = vmatpush.xpose.msk.msra.mxu3 %vm433_vm0, %v2610_v55  ;;  %v1485_v55 = vrot.slane %v4304_v11, 2 }
 0x1c1   : > { %2119 = vmatpush.xpose.msk.msra.mxu0 %vm433_vm0, %v4300_v3 }
 0x1c2   : > { %2136 = vmatpush.xpose.msk.msra.mxu1 %vm433_vm0, %v4301_v24  ;;  %2154 = vmatpush.xpose.msk.msra.mxu2 %vm433_vm0, %v2627_v19  ;;  %v4305_v19 = vld [vmem:[#allocation66_spill] sm:$0xff] }
 0x1c3   : > { %2171 = vmatpush.xpose.msk.msra.mxu3 %vm433_vm0, %v2633_v29  ;;  %v4306_v29 = vld [vmem:[#allocation67_spill] sm:$0xff] }
 0x1c5   : > { %2120 = vmatpush.xpose.msk.msra.mxu0 %vm433_vm0, %v4302_v48 }
 0x1c6   : > { %2137 = vmatpush.xpose.msk.msra.mxu1 %vm433_vm0, %v4303_v40  ;;  %2155 = vmatpush.xpose.msk.msra.mxu2 %vm433_vm0, %v2655_v61  ;;  %v1486_v61 = vsel %vm779_vm2, %v1483_v0, %v1485_v55  ;;  %v4307_v40 = vld [vmem:[#allocation38_spill] sm:$0xff] }
 0x1c7   : > { %2172 = vmatpush.xpose.msk.msra.mxu3 %vm433_vm0, %v2662_v47  ;;  %v1482_v47 = vrot.slane %v3503_v22, 2  ;;  %v4310_v22 = vld [vmem:[#allocation69_spill] sm:$0xff] }
 0x1c9   : > { %2121 = vmatpush.xpose.msk.msra.mxu0 %vm433_vm0, %v4305_v19  ;;  %v1484_v55 = vsel %vm779_vm2, %v1482_v47, %v1483_v0  ;;  %v2106_v47 = vld [vmem:[%s3987_s1 + $0x60] sm:$0xff] }
 0x1ca   : > { %2138 = vmatpush.xpose.msk.msra.mxu1 %vm433_vm0, %v4306_v29  ;;  %2156 = vmatpush.xpose.msk.msra.mxu2 %vm433_vm0, %v4257_v43  ;;  %v4309_v43 = vld [vmem:[#allocation68_spill] sm:$0xff] }
 0x1cb   : > { %2173 = vmatpush.xpose.msk.msra.mxu3 %vm433_vm0, %v4258_v59 }
 0x1cd   : > { %2122 = vmatpush.xpose.msk.msra.mxu0 %vm433_vm0, %v4307_v40 }
 0x1ce   : > { %2139 = vmatpush.xpose.msk.msra.mxu1 %vm433_vm0, %v4308_v25  ;;  %2157 = vmatpush.xpose.msk.msra.mxu2 %vm433_vm0, %v4261_v41  ;;  %v300_v41 = vld [vmem:[%s3988_s2] sm:$0xff] }
 0x1cf   : > { %2174 = vmatpush.xpose.msk.msra.mxu3 %vm433_vm0, %v4262_v63 }
 0x1d1   : > { %2123 = vmatpush.xpose.msk.msra.mxu0 %vm433_vm0, %v4309_v43  ;;  %2158 = vmatmul.msk.f32.vlgmr.msra.gmra.mxu2 %vm433_vm0, %v2106_v47 }
 0x1d2   : > { %2212 = vmatpush.xpose.msk.msrb.mxu2 %vm433_vm0, %v4308_v25  ;;  %2140 = vmatpush.xpose.msk.msra.mxu1 %vm433_vm0, %v4310_v22 }
 0x1d3   : > { %2229 = vmatpush.xpose.msk.msrb.mxu3 %vm433_vm0, %v1486_v61  ;;  %v2107_v61 = vld [vmem:[%s3987_s1 + $0x68] sm:$0xff] }
 0x1d4   : > { %2175 = vmatmul.msk.f32.vlgmr.msra.gmra.mxu3 %vm433_vm0, %v2106_v47  ;;  %2124 = vmatmul.msk.f32.vlgmr.msra.gmra.mxu0 %vm433_vm0, %v2107_v61 }
 0x1d5   : > { %2177 = vmatpush.xpose.msk.msrb.mxu0 %vm433_vm0, %v4258_v59  ;;  %2141 = vmatmul.msk.f32.vlgmr.msra.gmra.mxu1 %vm433_vm0, %v2107_v61 }
 0x1d6   : > { %2194 = vmatpush.xpose.msk.msrb.mxu1 %vm433_vm0, %v3510_v36  ;;  %2213 = vmatpush.xpose.msk.msrb.mxu2 %vm433_vm0, %v4310_v22  ;;  %v760_v22 = vpop.xlane.xlu0 %759 }
 0x1d7   : > { %2230 = vmatpush.xpose.msk.msrb.mxu3 %vm433_vm0, %v1484_v55 }
 0x1d9   : > { %2178 = vmatpush.xpose.msk.msrb.mxu0 %vm433_vm0, %v4262_v63 }
 0x1da   : > { %2195 = vmatpush.xpose.msk.msrb.mxu1 %vm433_vm0, %v3526_v12  ;;  %2214 = vmatpush.xpose.msk.msrb.mxu2 %vm433_vm0, %v3182_v52 }
 0x1db   : > { %2231 = vmatpush.xpose.msk.msrb.mxu3 %vm433_vm0, %v3186_v31 }
 0x1dd   : > { %2179 = vmatpush.xpose.msk.msrb.mxu0 %vm433_vm0, %v4244_v9 }
 0x1de   : > { %2196 = vmatpush.xpose.msk.msrb.mxu1 %vm433_vm0, %v4250_v2  ;;  %2215 = vmatpush.xpose.msk.msrb.mxu2 %vm433_vm0, %v3197_v49  ;;  %v766_v61 = vpop.xlane.xlu0 %765 }
 0x1df   : > { %2232 = vmatpush.xpose.msk.msrb.mxu3 %vm433_vm0, %v3204_v23 }
 0x1e1   : > { %2180 = vmatpush.xpose.msk.msrb.mxu0 %vm433_vm0, %v4249_v4 }
 0x1e2   : > { %2197 = vmatpush.xpose.msk.msrb.mxu1 %vm433_vm0, %v4251_v45  ;;  %2216 = vmatpush.xpose.msk.msrb.mxu2 %vm433_vm0, %v4252_v20 }
 0x1e3   : > { %2233 = vmatpush.xpose.msk.msrb.mxu3 %vm433_vm0, %v4253_v39 }
 0x1e5   : > { %2181 = vmatpush.xpose.msk.msrb.mxu0 %vm433_vm0, %v4254_v16 }
 0x1e6   : > { %2198 = vmatpush.xpose.msk.msrb.mxu1 %vm433_vm0, %v4255_v62  ;;  %2217 = vmatpush.xpose.msk.msrb.mxu2 %vm433_vm0, %v2943_v10 }
 0x1e7   : > { %2234 = vmatpush.xpose.msk.msrb.mxu3 %vm433_vm0, %v2946_v54 }
 0x1e9   : > { %2182 = vmatpush.xpose.msk.msrb.mxu0 %vm433_vm0, %v2395_v18  ;;  %v2295_v18 = vmov 0  }
 0x1ea   : > { %2199 = vmatpush.xpose.msk.msrb.mxu1 %vm433_vm0, %v2402_v21  ;;  %2218 = vmatpush.xpose.msk.msrb.mxu2 %vm433_vm0, %v2969_v14  ;;  %v4311_v21 = vld [vmem:[#allocation32_spill] sm:$0xff] }
 0x1eb   : > { %2235 = vmatpush.xpose.msk.msrb.mxu3 %vm433_vm0, %v2972_v15  ;;  %2261 = vset.pattern.permute.xlu2 %v2295_v18 }
 0x1ec   : > { %2262 = vset.pattern.permute.xlu0 %v2295_v18 }
 0x1ed   : > { %2183 = vmatpush.xpose.msk.msrb.mxu0 %vm433_vm0, %v2419_v26  ;;  %v4312_v26 = vld [vmem:[#allocation31_spill] sm:$0xff] }
 0x1ee   : > { %2200 = vmatpush.xpose.msk.msrb.mxu1 %vm433_vm0, %v2425_v28  ;;  %2219 = vmatpush.xpose.msk.msrb.mxu2 %vm433_vm0, %v2979_v1  ;;  %v4313_v28 = vld [vmem:[#allocation35_spill] sm:$0xff] }
 0x1ef   : > { %2236 = vmatpush.xpose.msk.msrb.mxu3 %vm433_vm0, %v2982_v8 }
 0x1f1   : > { %2184 = vmatpush.xpose.msk.msrb.mxu0 %vm433_vm0, %v2447_v34  ;;  %v4314_v34 = vld [vmem:[#allocation36_spill] sm:$0xff] }
 0x1f2   : > { %2201 = vmatpush.xpose.msk.msrb.mxu1 %vm433_vm0, %v2454_v37  ;;  %2220 = vmatpush.xpose.msk.msrb.mxu2 %vm433_vm0, %v4290_v7  ;;  %v1154_v37 = vpop.f32.mrf.mxu0 }
 0x1f3   : > { %2237 = vmatpush.xpose.msk.msrb.mxu3 %vm433_vm0, %v4291_v30 }
 0x1f5   : > { %2185 = vmatpush.xpose.msk.msrb.mxu0 %vm433_vm0, %v2471_v42  ;;  %v1174_v42 = vpop.f32.mrf.mxu1 }
 0x1f6   : > { %2202 = vmatpush.xpose.msk.msrb.mxu1 %vm433_vm0, %v2477_v44  ;;  %2221 = vmatpush.xpose.msk.msrb.mxu2 %vm433_vm0, %v4292_v32  ;;  %v2211_v44 = vld [vmem:[%s3987_s1 + $0x78] sm:$0xff] }
 0x1f7   : > { %2238 = vmatpush.xpose.msk.msrb.mxu3 %vm433_vm0, %v4293_v46 }
 0x1f9   : > { %2186 = vmatpush.xpose.msk.msrb.mxu0 %vm433_vm0, %v2499_v50  ;;  %v1197_v50 = vpop.f32.mrf.mxu2 }
 0x1fa   : > { %2203 = vmatpush.xpose.msk.msrb.mxu1 %vm433_vm0, %v2506_v53  ;;  %2222 = vmatpush.xpose.msk.msrb.mxu2 %vm433_vm0, %v4294_v56  ;;  %v1217_v53 = vpop.f32.mrf.mxu3 }
 0x1fb   : > { %2239 = vmatpush.xpose.msk.msrb.mxu3 %vm433_vm0, %v4295_v57  ;;  %v4317_v57 = vld [vmem:[#allocation48_spill] sm:$0xff] }
 0x1fd   : > { %2187 = vmatpush.xpose.msk.msrb.mxu0 %vm433_vm0, %v2523_v58  ;;  %v4315_v58 = vld [vmem:[#allocation41_spill] sm:$0xff] }
 0x1fe   : > { %2204 = vmatpush.xpose.msk.msrb.mxu1 %vm433_vm0, %v2529_v60  ;;  %2223 = vmatpush.xpose.msk.msrb.mxu2 %vm433_vm0, %v4296_v33  ;;  %v4316_v60 = vld [vmem:[#allocation42_spill] sm:$0xff] }
 0x1ff   : > { %2240 = vmatpush.xpose.msk.msrb.mxu3 %vm433_vm0, %v4297_v38  ;;  %v4318_v38 = vld [vmem:[#allocation50_spill] sm:$0xff] }
 0x201   : > { %2188 = vmatpush.xpose.msk.msrb.mxu0 %vm433_vm0, %v2551_v5  ;;  %v2176_v5 = vld [vmem:[%s3987_s1 + $0x70] sm:$0xff] }
 0x202   : > { %2205 = vmatpush.xpose.msk.msrb.mxu1 %vm433_vm0, %v2558_v13  ;;  %2224 = vmatpush.xpose.msk.msrb.mxu2 %vm433_vm0, %v4298_v6  ;;  %v1198_v13 = vadd.f32 %v1197_v50, %v1154_v37 }
 0x203   : > { %2241 = vmatpush.xpose.msk.msrb.mxu3 %vm433_vm0, %v4299_v17  ;;  %v4319_v17 = vld [vmem:[#allocation56_spill] sm:$0xff] }
 0x205   : > { %2189 = vmatpush.xpose.msk.msrb.mxu0 %vm433_vm0, %v2575_v27  ;;  %v1218_v27 = vadd.f32 %v1217_v53, %v1174_v42 }
 0x206   : > { %2206 = vmatpush.xpose.msk.msrb.mxu1 %vm433_vm0, %v2581_v35  ;;  %2225 = vmatpush.xpose.msk.msrb.mxu2 %vm433_vm0, %v4300_v3 }
 0x207   : > { %2242 = vmatpush.xpose.msk.msrb.mxu3 %vm433_vm0, %v4301_v24  ;;  %v4320_v24 = vld [vmem:[#allocation58_spill] sm:$0xff] }
 0x209   : > { %2190 = vmatpush.xpose.msk.msrb.mxu0 %vm433_vm0, %v2603_v51 }
 0x20a   : > { %2207 = vmatpush.xpose.msk.msrb.mxu1 %vm433_vm0, %v4311_v21  ;;  %2226 = vmatpush.xpose.msk.msrb.mxu2 %vm433_vm0, %v4302_v48 }
 0x20b   : > { %2243 = vmatpush.xpose.msk.msrb.mxu3 %vm433_vm0, %v4312_v26 }
 0x20d   : > { %2191 = vmatpush.xpose.msk.msrb.mxu0 %vm433_vm0, %v4313_v28 }
 0x20e   : > { %2208 = vmatpush.xpose.msk.msrb.mxu1 %vm433_vm0, %v4314_v34  ;;  %2227 = vmatpush.xpose.msk.msrb.mxu2 %vm433_vm0, %v4305_v19 }
 0x20f   : > { %2244 = vmatpush.xpose.msk.msrb.mxu3 %vm433_vm0, %v4306_v29  ;;  %v1117_v47 = vpop.xlane.xlu1 %1116 }
 0x210   : > { %v1118_v21 = vadd.f32 %v1117_v47, %v760_v22 }
 0x211   : > { %2192 = vmatpush.xpose.msk.msrb.mxu0 %vm433_vm0, %v4315_v58  ;;  %2228 = vmatmul.msk.f32.vlgmr.msrb.gmra.mxu2 %vm433_vm0, %v2211_v44  ;;  %v1248_v35 = vpop.f32.mrf.mxu0 }
 0x212   : > { %2209 = vmatpush.xpose.msk.msrb.mxu1 %vm433_vm0, %v4316_v60  ;;  %2245 = vmatmul.msk.f32.vlgmr.msrb.gmra.mxu3 %vm433_vm0, %v2211_v44  ;;  %v1268_v51 = vpop.f32.mrf.mxu1  ;;  %v1271_v19 = vadd.f32 %v1248_v35, %v1198_v13 }
 0x213   : > { %v1272_v29 = vadd.f32 %v1268_v51, %v1218_v27 }
 0x214   : > { %2193 = vmatmul.msk.f32.vlgmr.msrb.gmra.mxu0 %vm433_vm0, %v2176_v5  ;;  %v1305_v31 = vpop.f32.mrf.mxu2 }
 0x215   : > { %2210 = vmatmul.msk.f32.vlgmr.msrb.gmra.mxu1 %vm433_vm0, %v2176_v5  ;;  %v1328_v54 = vadd.f32 %v1305_v31, %v1271_v19 }
 0x217   : > { %v1325_v10 = vpop.f32.mrf.mxu3  ;;  %v1334_v1 = vmul.f32 %v1328_v54, %v1328_v54  ;;  %v1123_v18 = vpop.xlane.xlu1 %1122 }
 0x218   : > { %v1329_v14 = vadd.f32 %v1325_v10, %v1272_v29  ;;  %v1124_v26 = vadd.f32 %v1123_v18, %v766_v61 }
 0x21a   : > { %v1330_v15 = vadd.f32 %v1329_v14, %v1328_v54  ;;  %v1335_v8 = vmul.f32 %v1329_v14, %v1329_v14 }
 0x21c   : > { %1331 = vadd.xlane.f32.xlu2 %v1330_v15  ;;  %v1336_v63 = vadd.f32 %v1335_v8, %v1334_v1 }
 0x224   : > { %1337 = vadd.xlane.f32.xlu2 %v1336_v63 }
 0x23c   : > { %770 = vperm.xlu2 %2261, %v300_v41  }
 0x251   : > { %v1369_v9 = vpop.f32.mrf.mxu0 }
 0x252   : > { %v1389_v52 = vpop.f32.mrf.mxu1 }
 0x254   : > { %v1412_v4 = vpop.f32.mrf.mxu2 }
 0x255   : > { %v1413_v23 = vadd.f32 %v1412_v4, %v1369_v9 }
 0x257   : > { %v1432_v49 = vpop.f32.mrf.mxu3 }
 0x258   : > { %v1433_v2 = vadd.f32 %v1432_v49, %v1389_v52 }
 0x28f   : > { %v1332_v62 = vpop.xlane.xlu2 %1331 }
 0x290   : > { %v1333_v28 = vadd.f32 %v1332_v62, %v1118_v21 }
 0x291   : > { %v1457_v45 = vpop.f32.mrf.mxu0 }
 0x292   : > { %v1477_v20 = vpop.f32.mrf.mxu1  ;;  %v1480_v39 = vadd.f32 %v1457_v45, %v1413_v23 }
 0x293   : > { %v1481_v16 = vadd.f32 %v1477_v20, %v1433_v2 }
 0x294   : > { %v1513_v59 = vpop.f32.mrf.mxu2 }
 0x295   : > { %v1533_v36 = vpop.f32.mrf.mxu3  ;;  %v1536_v12 = vadd.f32 %v1513_v59, %v1480_v39 }
 0x296   : > { %v1537_v11 = vadd.f32 %v1533_v36, %v1481_v16 }
 0x297   : > { %v1542_v7 = vmul.f32 %v1536_v12, %v1536_v12  ;;  %v1338_v32 = vpop.xlane.xlu2 %1337 }
 0x298   : > { %v1538_v0 = vadd.f32 %v1537_v11, %v1536_v12  ;;  %v1543_v30 = vmul.f32 %v1537_v11, %v1537_v11  ;;  %v1339_v37 = vadd.f32 %v1338_v32, %v1124_v26 }
 0x29a   : > { %1539 = vadd.xlane.f32.xlu0 %v1538_v0  ;;  %v1544_v46 = vadd.f32 %v1543_v30, %v1542_v7 }
 0x29c   : > { %1545 = vadd.xlane.f32.xlu1 %v1544_v46 }
 0x29f   : > { %v771_v56 = vpop.permute.xlu2 %770 }
 0x2a0   : > { %v773_v33 = vadd.f32 %v771_v56, %v4317_v57  ;;  %v774_v6 = vadd.f32 %v771_v56, %v4318_v38  ;;  %v1125_v3 = vadd.f32 %v4319_v17, %v771_v56  ;;  %v1126_v48 = vadd.f32 %v4320_v24, %v771_v56 }
 0x2a1   : > { %v1340_v40 = vadd.f32 %v1328_v54, %v771_v56  ;;  %v1341_v25 = vadd.f32 %v1329_v14, %v771_v56  ;;  %v1548_v55 = vadd.f32 %v1536_v12, %v771_v56  ;;  %v1549_v43 = vadd.f32 %v1537_v11, %v771_v56 }
 0x2a2   : > { %775 = vst [vmem:[%s237_s13] sm:$0xff] %v773_v33 }
 0x2a3   : > { %776 = vst [vmem:[%s237_s13 + $0x8] sm:$0xff] %v774_v6 }
 0x2a4   : > { %1962 = vst [vmem:[%s237_s13 + $0x10] sm:$0xff] %v1125_v3 }
 0x2a5   : > { %1963 = vst [vmem:[%s237_s13 + $0x18] sm:$0xff] %v1126_v48 }
 0x2a6   : > { %2104 = vst [vmem:[%s237_s13 + $0x20] sm:$0xff] %v1340_v40 }
 0x2a7   : > { %2105 = vst [vmem:[%s237_s13 + $0x28] sm:$0xff] %v1341_v25 }
 0x2a8   : > { %2246 = vst [vmem:[%s237_s13 + $0x30] sm:$0xff] %v1548_v55 }
 0x2a9   : > { %2247 = vst [vmem:[%s237_s13 + $0x38] sm:$0xff] %v1549_v43 }
 0x30d   : > { %v1540_v34 = vpop.xlane.xlu0 %1539 }
 0x30e   : > { %v1541_v42 = vadd.f32 %v1540_v34, %v1333_v28 }
 0x30f   : > { %v1546_v44 = vpop.xlane.xlu1 %1545 }
 0x310   : > { %1554 = vst.msk [vmem:[%s241_s17] sm:$0xff] %vm1553_vm3, %v1541_v42  ;;  %v1547_v50 = vadd.f32 %v1546_v44, %v1339_v37 }
 0x312   : > { %1555 = vst.msk [vmem:[%s245_s22] sm:$0xff] %vm1553_vm3, %v1547_v50 }
 0x313 PF: > { %s16_s18 = sadd.s32 1, %s2293_s18  }
 0x314   : > { %p13_p4 = scmp.ge.s32.totalorder %s16_s18, 4  }
 0x316   :  { %15 = sbr.rel (!%p13_p4) target bundleno = 1 (0x1), region = 104 }

</bundles_post_ra>
